<compile_context>
chip_gen: v7x
topology: tpu7x:2x2x1
jax: 0.10.0
libtpu: 0.0.40
codegen_flags: <defaults>
</compile_context>

<pallas_src>
import functools
import math

import jax
import jax.numpy as jnp
from jax.experimental import pallas as pl
from jax.experimental.pallas import tpu as pltpu

LANE = 128  # all matmul output widths are padded to this for lane-dense stores


# --------------------------------------------------------------------------
# Pallas kernel: fused matmul + bias + (optional) ReLU
#   bf16 operands on the MXU, f32 accumulate, f32 epilogue, cast on store.
# --------------------------------------------------------------------------
def _matmul_bias_act_kernel(x_ref, w_ref, b_ref, o_ref, *, act):
    acc = jnp.dot(x_ref[...], w_ref[...], preferred_element_type=jnp.float32)
    acc = acc + b_ref[...]                       # (1, Np) f32 bias broadcast
    if act == "relu":
        acc = jnp.maximum(acc, 0.0)
    o_ref[...] = acc.astype(o_ref.dtype)


def linear_pallas(x, w, b, *, act="relu", out_dtype=jnp.bfloat16, block_m=512):
    """y = act(x @ w + b).  x: (M, K), w: (K, Np) bf16, b: (1, Np) f32, Np % 128 == 0."""
    M, K = x.shape
    Kw, Np = w.shape
    assert Kw == K and Np % LANE == 0, (x.shape, w.shape)

    if M <= block_m:
        bm = max(8, ((M + 15) // 16) * 16)       # one full-size, sublane-aligned tile
    else:
        bm = block_m
    Mp = ((M + bm - 1) // bm) * bm
    if Mp != M:
        x = jnp.pad(x, ((0, Mp - M), (0, 0)))

    out = pl.pallas_call(
        functools.partial(_matmul_bias_act_kernel, act=act),
        out_shape=jax.ShapeDtypeStruct((Mp, Np), out_dtype),
        grid=(Mp // bm,),
        in_specs=[
            pl.BlockSpec((bm, K), lambda i: (i, 0)),    # activations tile
            pl.BlockSpec((K, Np), lambda i: (0, 0)),    # full weight resident
            pl.BlockSpec((1, Np), lambda i: (0, 0)),    # bias
        ],
        out_specs=pl.BlockSpec((bm, Np), lambda i: (i, 0)),
        compiler_params=pltpu.CompilerParams(dimension_semantics=("parallel",)),
    )(x.astype(jnp.bfloat16), w, b)
    return out if Mp == M else out[:M]


# --------------------------------------------------------------------------
# NatureEncoder conv stack — im2col is layout glue (bf16), matmuls run in Pallas
# --------------------------------------------------------------------------
def _im2col(x, k, stride):
    """x: (N, H, W, C) -> (N*Ho*Wo, k*k*C) with (kh, kw, cin) minor ordering."""
    N, H, W, C = x.shape
    Ho = (H - k) // stride + 1
    Wo = (W - k) // stride + 1
    cols = []
    for i in range(k):
        for j in range(k):
            cols.append(x[:, i:i + Ho * stride:stride, j:j + Wo * stride:stride, :])
    patches = jnp.stack(cols, axis=3)                       # (N, Ho, Wo, k*k, C)
    return patches.reshape(N * Ho * Wo, k * k * C), Ho, Wo


def nature_encoder_flat(conv_params, x_nhwc):
    """Conv stack + fused Flatten.  Returns (N, Ho*Wo*128) bf16, lane-padded."""
    N = x_nhwc.shape[0]
    x = x_nhwc
    n_layers = len(conv_params)
    for li, (w, b, k, stride, cout) in enumerate(conv_params):
        cols, Ho, Wo = _im2col(x, k, stride)
        y = linear_pallas(cols, w, b, act="relu", out_dtype=jnp.bfloat16)  # (N*Ho*Wo, 128)
        if li + 1 < n_layers:
            # keep only the true channels for the next im2col; XLA fuses this
            # slice into the patch gather (no standalone HBM copy).
            x = y.reshape(N, Ho, Wo, LANE)[..., :cout]
        else:
            # fused Flatten: free row-major reshape of the lane-dense output;
            # the projection weight rows are laid out for this padded order.
            return y.reshape(N, Ho * Wo * LANE)


# --------------------------------------------------------------------------
# Parameter construction (deterministic, synthetic)
# --------------------------------------------------------------------------
def make_params(key, cfg):
    C = cfg["in_channels"]
    out_dim = cfg["hidden_dims"][-1]
    spec = [(32, 8, 4), (64, 4, 2), (64, 3, 1)]             # (cout, kernel, stride)
    keys = jax.random.split(key, len(spec) + 1)

    conv, cin = [], C
    s = int(math.sqrt(cfg["visual_dim"] // C))
    for kk, (cout, ks, st) in zip(keys[:-1], spec):
        # torch conv weight (Cout,Cin,K,K) -> (K,K,Cin,Cout) -> (K*K*Cin, Cout),
        # Cout zero-padded to 128 lanes (bias padding is zero -> relu -> 0).
        w = jax.random.normal(kk, (cout, cin, ks, ks), jnp.float32) / math.sqrt(cin * ks * ks)
        w = jnp.transpose(w, (2, 3, 1, 0)).reshape(ks * ks * cin, cout)
        w = jnp.pad(w, ((0, 0), (0, LANE - cout))).astype(jnp.bfloat16)
        b = jnp.zeros((1, LANE), jnp.float32)
        conv.append((w, b, ks, st, cout))
        cin, s = cout, (s - ks) // st + 1

    assert s * s * cin == 1024, "NatureEncoder.output_dim requires 64x64 input"

    # RLProjection weight (1024 -> out_dim), rows laid out for the padded-NHWC
    # flatten (s*s spatial rows x 128 padded channels); padded-channel rows and
    # padded output columns are zero.  Equivalent to a row permutation of the
    # torch (1024, out_dim) weight (weights are synthetic anyway).
    w = jax.random.normal(keys[-1], (s * s, cin, out_dim), jnp.float32) / math.sqrt(s * s * cin)
    w = jnp.pad(w, ((0, 0), (0, LANE - cin), (0, LANE - out_dim)))
    proj_w = w.reshape(s * s * LANE, LANE).astype(jnp.bfloat16)
    proj_b = jnp.zeros((1, LANE), jnp.float32)

    return dict(conv=conv, proj_w=proj_w, proj_b=proj_b)


# --------------------------------------------------------------------------
# NaturePureEncoder.forward
# --------------------------------------------------------------------------
def nature_pure_encoder(params, cfg, visual_x):
    C = cfg["in_channels"]
    wh = int(math.sqrt(cfg["visual_dim"] // C))
    out_dim = cfg["hidden_dims"][-1]

    x = visual_x.reshape(-1, C, wh, wh)                       # torch .view(-1, C, w, h)
    x = jnp.transpose(x, (0, 2, 3, 1)).astype(jnp.bfloat16)   # NCHW -> NHWC, bf16 MXU operands

    flat = nature_encoder_flat(params["conv"], x)             # (N, 2048) fused flatten (padded)

    # TODO(synk): exact RLProjection source unavailable; Linear + ReLU assumed.
    proj = linear_pallas(flat, params["proj_w"], params["proj_b"],
                         act="relu", out_dtype=jnp.float32)   # (N, 128) lane-dense
    return proj[:, :out_dim]                                  # (N, hidden_dims[-1]) f32


# --------------------------------------------------------------------------
if __name__ == "__main__":
    # 64x64 images are required by NatureEncoder.output_dim == 1024.
    cfg = dict(in_channels=4, visual_dim=4 * 64 * 64, hidden_dims=[32])
    T, B = 2, 2

    key = jax.random.PRNGKey(0)
    kx, kp = jax.random.split(key)
    visual_x = jax.random.normal(kx, (T, B, cfg["visual_dim"]), jnp.float32)
    params = make_params(kp, cfg)

    fwd = jax.jit(lambda v: nature_pure_encoder(params, cfg, v))
    out = fwd(visual_x)
    jax.block_until_ready(out)

    assert out.shape == (T * B, cfg["hidden_dims"][-1]), out.shape
    assert out.dtype == jnp.float32
    assert bool(jnp.all(jnp.isfinite(out)))
    print("KERNEL_OK")
</pallas_src>

<mosaic_0001>
module attributes {stable_mosaic.version = 11 : i64} {
  func.func @_matmul_bias_act_kernel(%arg0: i32, %arg1: memref<512x256xbf16, #tpu.memory_space<vmem>>, %arg2: memref<256x128xbf16, #tpu.memory_space<vmem>>, %arg3: memref<1x128xf32, #tpu.memory_space<vmem>>, %arg4: memref<512x128xbf16, #tpu.memory_space<vmem>>) attributes {dimension_semantics = [#tpu.dimension_semantics<parallel>], iteration_bounds = array<i64: 2>, scalar_prefetch = 0 : i64, scratch_operands = 0 : i64, tpu.core_type = #tpu.core_type<tc>, window_params = [{transform_indices = @transform_0, window_bounds = array<i64: 512, 256>}, {pipeline_mode = #tpu.pipeline_mode<synchronous>, transform_indices = @transform_1, window_bounds = array<i64: 256, 128>}, {pipeline_mode = #tpu.pipeline_mode<synchronous>, transform_indices = @transform_2, window_bounds = array<i64: 1, 128>}, {transform_indices = @transform_3, window_bounds = array<i64: 512, 128>}]} {
    %c0 = arith.constant 0 : index
    %c0_0 = arith.constant 0 : index
    %0 = vector.load %arg1[%c0, %c0_0] : memref<512x256xbf16, #tpu.memory_space<vmem>>, vector<512x256xbf16>
    %c0_1 = arith.constant 0 : index
    %c0_2 = arith.constant 0 : index
    %1 = vector.load %arg2[%c0_1, %c0_2] : memref<256x128xbf16, #tpu.memory_space<vmem>>, vector<256x128xbf16>
    %cst = arith.constant dense<0.000000e+00> : vector<512x128xf32>
    %2 = tpu.matmul %0, %1, %cst {dimension_numbers = #tpu.dot_dimension_numbers<[1], [0], [0], [1], [0, 0, 1, 1], [], []>} : vector<512x256xbf16>, vector<256x128xbf16>, vector<512x128xf32> -> vector<512x128xf32>
    %c0_3 = arith.constant 0 : index
    %c0_4 = arith.constant 0 : index
    %3 = vector.load %arg3[%c0_3, %c0_4] : memref<1x128xf32, #tpu.memory_space<vmem>>, vector<1x128xf32>
    %4 = vector.broadcast %3 : vector<1x128xf32> to vector<512x128xf32>
    %5 = arith.addf %2, %4 : vector<512x128xf32>
    %cst_5 = arith.constant 0.000000e+00 : f32
    %6 = vector.broadcast %cst_5 : f32 to vector<512x128xf32>
    %7 = arith.maximumf %5, %6 : vector<512x128xf32>
    %8 = arith.truncf %7 : vector<512x128xf32> to vector<512x128xbf16>
    %c0_6 = arith.constant 0 : index
    %c0_7 = arith.constant 0 : index
    %9 = vector.load %arg4[%c0_6, %c0_7] : memref<512x128xbf16, #tpu.memory_space<vmem>>, vector<512x128xbf16>
    tpu.vector_store %arg4[%c0_6, %c0_7], %8 {strides = array<i32>} : memref<512x128xbf16, #tpu.memory_space<vmem>>, vector<512x128xbf16>,
    return
  }
  func.func @transform_0(%arg0: i32) -> (i32, i32) {
    %c0_i32 = arith.constant 0 : i32
    %c0_i32_0 = arith.constant 0 : i32
    return %arg0, %c0_i32 : i32, i32
  }
  func.func @transform_1(%arg0: i32) -> (i32, i32) {
    %c0_i32 = arith.constant 0 : i32
    %c0_i32_0 = arith.constant 0 : i32
    %c0_i32_1 = arith.constant 0 : i32
    return %c0_i32, %c0_i32_0 : i32, i32
  }
  func.func @transform_2(%arg0: i32) -> (i32, i32) {
    %c0_i32 = arith.constant 0 : i32
    %c0_i32_0 = arith.constant 0 : i32
    %c0_i32_1 = arith.constant 0 : i32
    return %c0_i32, %c0_i32_0 : i32, i32
  }
  func.func @transform_3(%arg0: i32) -> (i32, i32) {
    %c0_i32 = arith.constant 0 : i32
    %c0_i32_0 = arith.constant 0 : i32
    return %arg0, %c0_i32 : i32, i32
  }
}

module attributes {stable_mosaic.version = 11 : i64} {
  func.func @_matmul_bias_act_kernel(%arg0: i32, %arg1: memref<144x512xbf16, #tpu.memory_space<vmem>>, %arg2: memref<512x128xbf16, #tpu.memory_space<vmem>>, %arg3: memref<1x128xf32, #tpu.memory_space<vmem>>, %arg4: memref<144x128xbf16, #tpu.memory_space<vmem>>) attributes {dimension_semantics = [#tpu.dimension_semantics<parallel>], iteration_bounds = array<i64: 1>, scalar_prefetch = 0 : i64, scratch_operands = 0 : i64, tpu.core_type = #tpu.core_type<tc>, window_params = [{transform_indices = @transform_0, window_bounds = array<i64: 144, 512>}, {pipeline_mode = #tpu.pipeline_mode<synchronous>, transform_indices = @transform_1, window_bounds = array<i64: 512, 128>}, {pipeline_mode = #tpu.pipeline_mode<synchronous>, transform_indices = @transform_2, window_bounds = array<i64: 1, 128>}, {transform_indices = @transform_3, window_bounds = array<i64: 144, 128>}]} {
    %c0 = arith.constant 0 : index
    %c0_0 = arith.constant 0 : index
    %0 = vector.load %arg1[%c0, %c0_0] : memref<144x512xbf16, #tpu.memory_space<vmem>>, vector<144x512xbf16>
    %c0_1 = arith.constant 0 : index
    %c0_2 = arith.constant 0 : index
    %1 = vector.load %arg2[%c0_1, %c0_2] : memref<512x128xbf16, #tpu.memory_space<vmem>>, vector<512x128xbf16>
    %cst = arith.constant dense<0.000000e+00> : vector<144x128xf32>
    %2 = tpu.matmul %0, %1, %cst {dimension_numbers = #tpu.dot_dimension_numbers<[1], [0], [0], [1], [0, 0, 1, 1], [], []>} : vector<144x512xbf16>, vector<512x128xbf16>, vector<144x128xf32> -> vector<144x128xf32>
    %c0_3 = arith.constant 0 : index
    %c0_4 = arith.constant 0 : index
    %3 = vector.load %arg3[%c0_3, %c0_4] : memref<1x128xf32, #tpu.memory_space<vmem>>, vector<1x128xf32>
    %4 = vector.broadcast %3 : vector<1x128xf32> to vector<144x128xf32>
    %5 = arith.addf %2, %4 : vector<144x128xf32>
    %cst_5 = arith.constant 0.000000e+00 : f32
    %6 = vector.broadcast %cst_5 : f32 to vector<144x128xf32>
    %7 = arith.maximumf %5, %6 : vector<144x128xf32>
    %8 = arith.truncf %7 : vector<144x128xf32> to vector<144x128xbf16>
    %c0_6 = arith.constant 0 : index
    %c0_7 = arith.constant 0 : index
    %9 = vector.load %arg4[%c0_6, %c0_7] : memref<144x128xbf16, #tpu.memory_space<vmem>>, vector<144x128xbf16>
    tpu.vector_store %arg4[%c0_6, %c0_7], %8 {strides = array<i32>} : memref<144x128xbf16, #tpu.memory_space<vmem>>, vector<144x128xbf16>,
    return
  }
  func.func @transform_0(%arg0: i32) -> (i32, i32) {
    %c0_i32 = arith.constant 0 : i32
    %c0_i32_0 = arith.constant 0 : i32
    return %arg0, %c0_i32 : i32, i32
  }
  func.func @transform_1(%arg0: i32) -> (i32, i32) {
    %c0_i32 = arith.constant 0 : i32
    %c0_i32_0 = arith.constant 0 : i32
    %c0_i32_1 = arith.constant 0 : i32
    return %c0_i32, %c0_i32_0 : i32, i32
  }
  func.func @transform_2(%arg0: i32) -> (i32, i32) {
    %c0_i32 = arith.constant 0 : i32
    %c0_i32_0 = arith.constant 0 : i32
    %c0_i32_1 = arith.constant 0 : i32
    return %c0_i32, %c0_i32_0 : i32, i32
  }
  func.func @transform_3(%arg0: i32) -> (i32, i32) {
    %c0_i32 = arith.constant 0 : i32
    %c0_i32_0 = arith.constant 0 : i32
    return %arg0, %c0_i32 : i32, i32
  }
}

module attributes {stable_mosaic.version = 11 : i64} {
  func.func @_matmul_bias_act_kernel(%arg0: i32, %arg1: memref<64x576xbf16, #tpu.memory_space<vmem>>, %arg2: memref<576x128xbf16, #tpu.memory_space<vmem>>, %arg3: memref<1x128xf32, #tpu.memory_space<vmem>>, %arg4: memref<64x128xbf16, #tpu.memory_space<vmem>>) attributes {dimension_semantics = [#tpu.dimension_semantics<parallel>], iteration_bounds = array<i64: 1>, scalar_prefetch = 0 : i64, scratch_operands = 0 : i64, tpu.core_type = #tpu.core_type<tc>, window_params = [{transform_indices = @transform_0, window_bounds = array<i64: 64, 576>}, {pipeline_mode = #tpu.pipeline_mode<synchronous>, transform_indices = @transform_1, window_bounds = array<i64: 576, 128>}, {pipeline_mode = #tpu.pipeline_mode<synchronous>, transform_indices = @transform_2, window_bounds = array<i64: 1, 128>}, {transform_indices = @transform_3, window_bounds = array<i64: 64, 128>}]} {
    %c0 = arith.constant 0 : index
    %c0_0 = arith.constant 0 : index
    %0 = vector.load %arg1[%c0, %c0_0] : memref<64x576xbf16, #tpu.memory_space<vmem>>, vector<64x576xbf16>
    %c0_1 = arith.constant 0 : index
    %c0_2 = arith.constant 0 : index
    %1 = vector.load %arg2[%c0_1, %c0_2] : memref<576x128xbf16, #tpu.memory_space<vmem>>, vector<576x128xbf16>
    %cst = arith.constant dense<0.000000e+00> : vector<64x128xf32>
    %2 = tpu.matmul %0, %1, %cst {dimension_numbers = #tpu.dot_dimension_numbers<[1], [0], [0], [1], [0, 0, 1, 1], [], []>} : vector<64x576xbf16>, vector<576x128xbf16>, vector<64x128xf32> -> vector<64x128xf32>
    %c0_3 = arith.constant 0 : index
    %c0_4 = arith.constant 0 : index
    %3 = vector.load %arg3[%c0_3, %c0_4] : memref<1x128xf32, #tpu.memory_space<vmem>>, vector<1x128xf32>
    %4 = vector.broadcast %3 : vector<1x128xf32> to vector<64x128xf32>
    %5 = arith.addf %2, %4 : vector<64x128xf32>
    %cst_5 = arith.constant 0.000000e+00 : f32
    %6 = vector.broadcast %cst_5 : f32 to vector<64x128xf32>
    %7 = arith.maximumf %5, %6 : vector<64x128xf32>
    %8 = arith.truncf %7 : vector<64x128xf32> to vector<64x128xbf16>
    %c0_6 = arith.constant 0 : index
    %c0_7 = arith.constant 0 : index
    %9 = vector.load %arg4[%c0_6, %c0_7] : memref<64x128xbf16, #tpu.memory_space<vmem>>, vector<64x128xbf16>
    tpu.vector_store %arg4[%c0_6, %c0_7], %8 {strides = array<i32>} : memref<64x128xbf16, #tpu.memory_space<vmem>>, vector<64x128xbf16>,
    return
  }
  func.func @transform_0(%arg0: i32) -> (i32, i32) {
    %c0_i32 = arith.constant 0 : i32
    %c0_i32_0 = arith.constant 0 : i32
    return %arg0, %c0_i32 : i32, i32
  }
  func.func @transform_1(%arg0: i32) -> (i32, i32) {
    %c0_i32 = arith.constant 0 : i32
    %c0_i32_0 = arith.constant 0 : i32
    %c0_i32_1 = arith.constant 0 : i32
    return %c0_i32, %c0_i32_0 : i32, i32
  }
  func.func @transform_2(%arg0: i32) -> (i32, i32) {
    %c0_i32 = arith.constant 0 : i32
    %c0_i32_0 = arith.constant 0 : i32
    %c0_i32_1 = arith.constant 0 : i32
    return %c0_i32, %c0_i32_0 : i32, i32
  }
  func.func @transform_3(%arg0: i32) -> (i32, i32) {
    %c0_i32 = arith.constant 0 : i32
    %c0_i32_0 = arith.constant 0 : i32
    return %arg0, %c0_i32 : i32, i32
  }
}

module attributes {stable_mosaic.version = 11 : i64} {
  func.func @_matmul_bias_act_kernel(%arg0: i32, %arg1: memref<16x2048xbf16, #tpu.memory_space<vmem>>, %arg2: memref<2048x128xbf16, #tpu.memory_space<vmem>>, %arg3: memref<1x128xf32, #tpu.memory_space<vmem>>, %arg4: memref<16x128xf32, #tpu.memory_space<vmem>>) attributes {dimension_semantics = [#tpu.dimension_semantics<parallel>], iteration_bounds = array<i64: 1>, scalar_prefetch = 0 : i64, scratch_operands = 0 : i64, tpu.core_type = #tpu.core_type<tc>, window_params = [{transform_indices = @transform_0, window_bounds = array<i64: 16, 2048>}, {pipeline_mode = #tpu.pipeline_mode<synchronous>, transform_indices = @transform_1, window_bounds = array<i64: 2048, 128>}, {pipeline_mode = #tpu.pipeline_mode<synchronous>, transform_indices = @transform_2, window_bounds = array<i64: 1, 128>}, {transform_indices = @transform_3, window_bounds = array<i64: 16, 128>}]} {
    %c0 = arith.constant 0 : index
    %c0_0 = arith.constant 0 : index
    %0 = vector.load %arg1[%c0, %c0_0] : memref<16x2048xbf16, #tpu.memory_space<vmem>>, vector<16x2048xbf16>
    %c0_1 = arith.constant 0 : index
    %c0_2 = arith.constant 0 : index
    %1 = vector.load %arg2[%c0_1, %c0_2] : memref<2048x128xbf16, #tpu.memory_space<vmem>>, vector<2048x128xbf16>
    %cst = arith.constant dense<0.000000e+00> : vector<16x128xf32>
    %2 = tpu.matmul %0, %1, %cst {dimension_numbers = #tpu.dot_dimension_numbers<[1], [0], [0], [1], [0, 0, 1, 1], [], []>} : vector<16x2048xbf16>, vector<2048x128xbf16>, vector<16x128xf32> -> vector<16x128xf32>
    %c0_3 = arith.constant 0 : index
    %c0_4 = arith.constant 0 : index
    %3 = vector.load %arg3[%c0_3, %c0_4] : memref<1x128xf32, #tpu.memory_space<vmem>>, vector<1x128xf32>
    %4 = vector.broadcast %3 : vector<1x128xf32> to vector<16x128xf32>
    %5 = arith.addf %2, %4 : vector<16x128xf32>
    %cst_5 = arith.constant 0.000000e+00 : f32
    %6 = vector.broadcast %cst_5 : f32 to vector<16x128xf32>
    %7 = arith.maximumf %5, %6 : vector<16x128xf32>
    %c0_6 = arith.constant 0 : index
    %c0_7 = arith.constant 0 : index
    %8 = vector.load %arg4[%c0_6, %c0_7] : memref<16x128xf32, #tpu.memory_space<vmem>>, vector<16x128xf32>
    tpu.vector_store %arg4[%c0_6, %c0_7], %7 {strides = array<i32>} : memref<16x128xf32, #tpu.memory_space<vmem>>, vector<16x128xf32>,
    return
  }
  func.func @transform_0(%arg0: i32) -> (i32, i32) {
    %c0_i32 = arith.constant 0 : i32
    %c0_i32_0 = arith.constant 0 : i32
    return %arg0, %c0_i32 : i32, i32
  }
  func.func @transform_1(%arg0: i32) -> (i32, i32) {
    %c0_i32 = arith.constant 0 : i32
    %c0_i32_0 = arith.constant 0 : i32
    %c0_i32_1 = arith.constant 0 : i32
    return %c0_i32, %c0_i32_0 : i32, i32
  }
  func.func @transform_2(%arg0: i32) -> (i32, i32) {
    %c0_i32 = arith.constant 0 : i32
    %c0_i32_0 = arith.constant 0 : i32
    %c0_i32_1 = arith.constant 0 : i32
    return %c0_i32, %c0_i32_0 : i32, i32
  }
  func.func @transform_3(%arg0: i32) -> (i32, i32) {
    %c0_i32 = arith.constant 0 : i32
    %c0_i32_0 = arith.constant 0 : i32
    return %arg0, %c0_i32 : i32, i32
  }
}

</mosaic_0001>

<bundles_post_ra>
// kernel: _lambda_.4
= control target key start
LH: loop header
LB: loop body
LE: loop exit
PB: predicated region body
PF: predicated region fallthrough
CT: control target
= control target key end

     0   :  { %s2021_s12 = smov 0   ;;  %s2291_s0 = inlined_call_operand.vmem [shape: bf16[1024,256], index: 0, kind: input, shape index: {}]   ;;  %s2292_s1 = inlined_call_operand.vmem [shape: bf16[256,128], index: 1, kind: input, shape index: {}]   ;;  %s2293_s2 = inlined_call_operand.vmem [shape: f32[1,128], index: 2, kind: input, shape index: {}]   ;;  %s2294_s3 = inlined_call_operand.vmem [shape: bf16[1024,128], index: 3, kind: output, shape index: {}]  }
   0x1 LB: > { %s1426_s13 = sadd.s32 4294967295, %s1998_s12   ;;  %p1430_p0 = scmp.ge.s32.totalorder %s1998_s12, 1  ;;  %s1998_s12 = sphi %s2021_s12, %s13_s12  }
   0x2   : > { %p139_p1 = scmp.lt.s32.totalorder %s1998_s12, 3 }
   0x4   : > { %p140_p2 = pnand %p1430_p0, %p139_p1 }
   0x5   : > { %v1880_v0 = vld [vmem:[%s2292_s1] sm:$0xff] (!%p140_p2)   ;;  %v2000_v1 = vmov (!%p140_p2), 0   ;;  %s1431_s16 = sshll.u32 (!%p140_p2), %s1426_s13, 6  ;;  %v1881_v2 = vld [vmem:[%s2292_s1 + $0x8] sm:$0xff] (!%p140_p2)   ;;  %v1882_v3 = vld [vmem:[%s2292_s1 + $0x10] sm:$0xff] (!%p140_p2)  }
   0x6   : > { %143 = sbr.rel (%p140_p2) target bundleno = 411 (0x19b), region = 32  ;;  %697 = vmatprep.subr.bf16.mxu0 (!%p140_p2), %v2000_v1  ;;  %1839 = vmatprep.subr.bf16.mxu1 (!%p140_p2), %v2000_v1  ;;  %p165_p3 = scmp.lt.s32.totalorder (!%p140_p2), %s1431_s16, 127  ;;  %v1883_v4 = vld [vmem:[%s2292_s1 + $0x18] sm:$0xff] (!%p140_p2)   ;;  %v1884_v5 = vld [vmem:[%s2292_s1 + $0x20] sm:$0xff] (!%p140_p2)   ;;  %v1885_v7 = vld [vmem:[%s2292_s1 + $0x28] sm:$0xff] (!%p140_p2)  }
   0x7   : > { %698 = vmatpush1.bf16.msra.mxu0 (!%p140_p2), %v1880_v0  ;;  %1855 = vmatpush1.bf16.msra.mxu1 (!%p140_p2), %v1880_v0  ;;  %v1886_v9 = vld [vmem:[%s2292_s1 + $0x30] sm:$0xff] (!%p140_p2)   ;;  %v1887_v10 = vld [vmem:[%s2292_s1 + $0x38] sm:$0xff] (!%p140_p2)   ;;  %v1888_v11 = vld [vmem:[%s2292_s1 + $0x40] sm:$0xff] (!%p140_p2)  }
   0x8   : > { %699 = vmatprep.subr.bf16.mxu0 (!%p140_p2), %v2000_v1  ;;  %1840 = vmatprep.subr.bf16.mxu1 (!%p140_p2), %v2000_v1  ;;  %v1889_v12 = vld [vmem:[%s2292_s1 + $0x48] sm:$0xff] (!%p140_p2)   ;;  %v1890_v13 = vld [vmem:[%s2292_s1 + $0x50] sm:$0xff] (!%p140_p2)   ;;  %v1891_v14 = vld [vmem:[%s2292_s1 + $0x58] sm:$0xff] (!%p140_p2)  }
   0x9   : > { %v1892_v15 = vld [vmem:[%s2292_s1 + $0x60] sm:$0xff] (!%p140_p2)   ;;  %v1893_v16 = vld [vmem:[%s2292_s1 + $0x68] sm:$0xff] (!%p140_p2)   ;;  %v1894_v17 = vld [vmem:[%s2292_s1 + $0x70] sm:$0xff] (!%p140_p2)  }
   0xa   : > { %v1895_v18 = vld [vmem:[%s2292_s1 + $0x78] sm:$0xff] (!%p140_p2)  }
   0xb   : > { %700 = vmatpush1.bf16.msra.mxu0 (!%p140_p2), %v1881_v2  ;;  %1856 = vmatpush1.bf16.msra.mxu1 (!%p140_p2), %v1881_v2 }
   0xc   : > { %701 = vmatprep.subr.bf16.mxu0 (!%p140_p2), %v2000_v1  ;;  %1841 = vmatprep.subr.bf16.mxu1 (!%p140_p2), %v2000_v1 }
   0xd   : > { %s2296_s16 = smov (!%p165_p3, %s1431_s16), 127 }
   0xe   : > { %s1583_s23 = sshll.u32 %s2296_s16, 3  ;;  %s1435_s29 = sshll.u32 %s2296_s16, 2 }
   0xf   : > { %702 = vmatpush1.bf16.msra.mxu0 %v1882_v3  ;;  %1857 = vmatpush1.bf16.msra.mxu1 %v1882_v3  ;;  %s2058_s28 = scalar_lea.vmem %s2291_s0, %s1583_s23  ;;  %s2194_s4 = scalar_lea.vmem %s2294_s3, %s1435_s29 }
  0x10   : > { %703 = vmatprep.subr.bf16.mxu0 %v2000_v1  ;;  %1842 = vmatprep.subr.bf16.mxu1 %v2000_v1  ;;  %v1898_v6 = vld [vmem:[%s2058_s28 + $0x4] ss:$8 sps:$4 sm:$0xff]   ;;  %v1896_v19 = vld [vmem:[%s2058_s28] ss:$8 sps:$4 sm:$0xff]   ;;  %v1902_v21 = vld [vmem:[%s2058_s28 + $0x14] ss:$8 sps:$4 sm:$0xff]  }
  0x11   : > { %v1901_v8 = vld [vmem:[%s2058_s28 + $0x104] ss:$8 sps:$4 sm:$0xff]   ;;  %729 = vmatprep.mubr.bf16.mxu0 %v1898_v6  ;;  %v1899_v20 = vld [vmem:[%s2058_s28 + $0x100] ss:$8 sps:$4 sm:$0xff]   ;;  %v1904_v22 = vld [vmem:[%s2058_s28 + $0x114] ss:$8 sps:$4 sm:$0xff]  }
  0x12   : > { %857 = vmatprep.mubr.bf16.mxu1 %v1901_v8  ;;  %v1906_v23 = vld [vmem:[%s2058_s28 + $0x10] ss:$8 sps:$4 sm:$0xff]   ;;  %v1908_v25 = vld [vmem:[%s2058_s28 + $0x24] ss:$8 sps:$4 sm:$0xff]   ;;  %v1912_v27 = vld [vmem:[%s2058_s28 + $0x20] ss:$8 sps:$4 sm:$0xff]  }
  0x13   : > { %704 = vmatpush1.bf16.msra.mxu0 %v1883_v4  ;;  %1858 = vmatpush1.bf16.msra.mxu1 %v1883_v4  ;;  %v1907_v24 = vld [vmem:[%s2058_s28 + $0x110] ss:$8 sps:$4 sm:$0xff]   ;;  %v1910_v26 = vld [vmem:[%s2058_s28 + $0x124] ss:$8 sps:$4 sm:$0xff]   ;;  %v1913_v28 = vld [vmem:[%s2058_s28 + $0x120] ss:$8 sps:$4 sm:$0xff]  }
  0x14   : > { %705 = vmatprep.subr.bf16.mxu0 %v2000_v1  ;;  %1843 = vmatprep.subr.bf16.mxu1 %v2000_v1  ;;  %v1914_v29 = vld [vmem:[%s2058_s28 + $0x34] ss:$8 sps:$4 sm:$0xff]   ;;  %v1918_v31 = vld [vmem:[%s2058_s28 + $0x30] ss:$8 sps:$4 sm:$0xff]   ;;  %v1920_v33 = vld [vmem:[%s2058_s28 + $0x44] ss:$8 sps:$4 sm:$0xff]  }
  0x15   : > { %v1916_v30 = vld [vmem:[%s2058_s28 + $0x134] ss:$8 sps:$4 sm:$0xff]   ;;  %v1919_v32 = vld [vmem:[%s2058_s28 + $0x130] ss:$8 sps:$4 sm:$0xff]   ;;  %v1922_v34 = vld [vmem:[%s2058_s28 + $0x144] ss:$8 sps:$4 sm:$0xff]  }
  0x16   : > { %v1924_v35 = vld [vmem:[%s2058_s28 + $0x40] ss:$8 sps:$4 sm:$0xff]   ;;  %v1926_v37 = vld [vmem:[%s2058_s28 + $0x54] ss:$8 sps:$4 sm:$0xff]   ;;  %v1930_v39 = vld [vmem:[%s2058_s28 + $0x50] ss:$8 sps:$4 sm:$0xff]  }
  0x17   : > { %706 = vmatpush1.bf16.msra.mxu0 %v1884_v5  ;;  %1859 = vmatpush1.bf16.msra.mxu1 %v1884_v5  ;;  %v1925_v36 = vld [vmem:[%s2058_s28 + $0x140] ss:$8 sps:$4 sm:$0xff]   ;;  %v1928_v38 = vld [vmem:[%s2058_s28 + $0x154] ss:$8 sps:$4 sm:$0xff]   ;;  %v1931_v40 = vld [vmem:[%s2058_s28 + $0x150] ss:$8 sps:$4 sm:$0xff]  }
  0x18   : > { %707 = vmatprep.subr.bf16.mxu0 %v2000_v1  ;;  %1844 = vmatprep.subr.bf16.mxu1 %v2000_v1  ;;  %v1932_v41 = vld [vmem:[%s2058_s28 + $0x64] ss:$8 sps:$4 sm:$0xff]   ;;  %v1936_v43 = vld [vmem:[%s2058_s28 + $0x60] ss:$8 sps:$4 sm:$0xff]   ;;  %v1938_v45 = vld [vmem:[%s2058_s28 + $0x74] ss:$8 sps:$4 sm:$0xff]  }
  0x19   : > { %v1934_v42 = vld [vmem:[%s2058_s28 + $0x164] ss:$8 sps:$4 sm:$0xff]   ;;  %v1937_v44 = vld [vmem:[%s2058_s28 + $0x160] ss:$8 sps:$4 sm:$0xff]   ;;  %v1940_v46 = vld [vmem:[%s2058_s28 + $0x174] ss:$8 sps:$4 sm:$0xff]  }
  0x1a   : > { %v1942_v47 = vld [vmem:[%s2058_s28 + $0x70] ss:$8 sps:$4 sm:$0xff]   ;;  %v1944_v49 = vld [vmem:[%s2058_s28 + $0x84] ss:$8 sps:$4 sm:$0xff]   ;;  %v1948_v51 = vld [vmem:[%s2058_s28 + $0x80] ss:$8 sps:$4 sm:$0xff]  }
  0x1b   : > { %708 = vmatpush1.bf16.msra.mxu0 %v1885_v7  ;;  %1860 = vmatpush1.bf16.msra.mxu1 %v1885_v7  ;;  %v1943_v48 = vld [vmem:[%s2058_s28 + $0x170] ss:$8 sps:$4 sm:$0xff]   ;;  %v1946_v50 = vld [vmem:[%s2058_s28 + $0x184] ss:$8 sps:$4 sm:$0xff]   ;;  %v1949_v52 = vld [vmem:[%s2058_s28 + $0x180] ss:$8 sps:$4 sm:$0xff]  }
  0x1c   : > { %709 = vmatprep.subr.bf16.mxu0 %v2000_v1  ;;  %1845 = vmatprep.subr.bf16.mxu1 %v2000_v1  ;;  %v1950_v53 = vld [vmem:[%s2058_s28 + $0x94] ss:$8 sps:$4 sm:$0xff]   ;;  %v1954_v55 = vld [vmem:[%s2058_s28 + $0x90] ss:$8 sps:$4 sm:$0xff]   ;;  %v1956_v57 = vld [vmem:[%s2058_s28 + $0xa4] ss:$8 sps:$4 sm:$0xff]  }
  0x1d   : > { %v1952_v54 = vld [vmem:[%s2058_s28 + $0x194] ss:$8 sps:$4 sm:$0xff]   ;;  %v1955_v56 = vld [vmem:[%s2058_s28 + $0x190] ss:$8 sps:$4 sm:$0xff]   ;;  %v1958_v58 = vld [vmem:[%s2058_s28 + $0x1a4] ss:$8 sps:$4 sm:$0xff]  }
  0x1e   : > { %v1960_v59 = vld [vmem:[%s2058_s28 + $0xa0] ss:$8 sps:$4 sm:$0xff]   ;;  %v1962_v61 = vld [vmem:[%s2058_s28 + $0xb4] ss:$8 sps:$4 sm:$0xff]   ;;  %v1966_v63 = vld [vmem:[%s2058_s28 + $0xb0] ss:$8 sps:$4 sm:$0xff]  }
  0x1f   : > { %710 = vmatpush1.bf16.msra.mxu0 %v1886_v9  ;;  %1861 = vmatpush1.bf16.msra.mxu1 %v1886_v9  ;;  %v1961_v60 = vld [vmem:[%s2058_s28 + $0x1a0] ss:$8 sps:$4 sm:$0xff]   ;;  %v1964_v62 = vld [vmem:[%s2058_s28 + $0x1b4] ss:$8 sps:$4 sm:$0xff]   ;;  %v1967_v0 = vld [vmem:[%s2058_s28 + $0x1b0] ss:$8 sps:$4 sm:$0xff]  }
  0x20   : > { %711 = vmatprep.subr.bf16.mxu0 %v2000_v1  ;;  %1846 = vmatprep.subr.bf16.mxu1 %v2000_v1  ;;  %v1970_v2 = vld [vmem:[%s2058_s28 + $0x1c4] ss:$8 sps:$4 sm:$0xff]   ;;  %v1972_v3 = vld [vmem:[%s2058_s28 + $0xc0] ss:$8 sps:$4 sm:$0xff]   ;;  %v1974_v5 = vld [vmem:[%s2058_s28 + $0xd4] ss:$8 sps:$4 sm:$0xff]  }
  0x21   : > { %v1973_v4 = vld [vmem:[%s2058_s28 + $0x1c0] ss:$8 sps:$4 sm:$0xff]   ;;  %v1976_v6 = vld [vmem:[%s2058_s28 + $0x1d4] ss:$8 sps:$4 sm:$0xff]   ;;  %v1978_v7 = vld [vmem:[%s2058_s28 + $0xd0] ss:$8 sps:$4 sm:$0xff]  }
  0x22   : > { %v1979_v8 = vld [vmem:[%s2058_s28 + $0x1d0] ss:$8 sps:$4 sm:$0xff]   ;;  %v1980_v9 = vld [vmem:[%s2058_s28 + $0xe4] ss:$8 sps:$4 sm:$0xff]  }
  0x23   : > { %712 = vmatpush1.bf16.msra.mxu0 %v1887_v10  ;;  %1862 = vmatpush1.bf16.msra.mxu1 %v1887_v10  ;;  %v1982_v10 = vld [vmem:[%s2058_s28 + $0x1e4] ss:$8 sps:$4 sm:$0xff]  }
  0x24   : > { %713 = vmatprep.subr.bf16.mxu0 %v2000_v1  ;;  %1847 = vmatprep.subr.bf16.mxu1 %v2000_v1 }
  0x27   : > { %714 = vmatpush1.bf16.msra.mxu0 %v1888_v11  ;;  %1863 = vmatpush1.bf16.msra.mxu1 %v1888_v11  ;;  %v1984_v11 = vld [vmem:[%s2058_s28 + $0xe0] ss:$8 sps:$4 sm:$0xff]  }
  0x28   : > { %715 = vmatprep.subr.bf16.mxu0 %v2000_v1  ;;  %1848 = vmatprep.subr.bf16.mxu1 %v2000_v1 }
  0x2b   : > { %716 = vmatpush1.bf16.msra.mxu0 %v1889_v12  ;;  %1864 = vmatpush1.bf16.msra.mxu1 %v1889_v12  ;;  %v1985_v12 = vld [vmem:[%s2058_s28 + $0x1e0] ss:$8 sps:$4 sm:$0xff]  }
  0x2c   : > { %717 = vmatprep.subr.bf16.mxu0 %v2000_v1  ;;  %1849 = vmatprep.subr.bf16.mxu1 %v2000_v1 }
  0x2f   : > { %718 = vmatpush1.bf16.msra.mxu0 %v1890_v13  ;;  %1865 = vmatpush1.bf16.msra.mxu1 %v1890_v13  ;;  %v1986_v13 = vld [vmem:[%s2058_s28 + $0xf4] ss:$8 sps:$4 sm:$0xff]  }
  0x30   : > { %719 = vmatprep.subr.bf16.mxu0 %v2000_v1  ;;  %1850 = vmatprep.subr.bf16.mxu1 %v2000_v1 }
  0x33   : > { %720 = vmatpush1.bf16.msra.mxu0 %v1891_v14  ;;  %1866 = vmatpush1.bf16.msra.mxu1 %v1891_v14  ;;  %v1988_v14 = vld [vmem:[%s2058_s28 + $0x1f4] ss:$8 sps:$4 sm:$0xff]  }
  0x34   : > { %721 = vmatprep.subr.bf16.mxu0 %v2000_v1  ;;  %1851 = vmatprep.subr.bf16.mxu1 %v2000_v1 }
  0x37   : > { %722 = vmatpush1.bf16.msra.mxu0 %v1892_v15  ;;  %1867 = vmatpush1.bf16.msra.mxu1 %v1892_v15  ;;  %v1990_v15 = vld [vmem:[%s2058_s28 + $0xf0] ss:$8 sps:$4 sm:$0xff]  }
  0x38   : > { %723 = vmatprep.subr.bf16.mxu0 %v2000_v1  ;;  %1852 = vmatprep.subr.bf16.mxu1 %v2000_v1 }
  0x3b   : > { %724 = vmatpush1.bf16.msra.mxu0 %v1893_v16  ;;  %1868 = vmatpush1.bf16.msra.mxu1 %v1893_v16  ;;  %v1991_v16 = vld [vmem:[%s2058_s28 + $0x1f0] ss:$8 sps:$4 sm:$0xff]  }
  0x3c   : > { %725 = vmatprep.subr.bf16.mxu0 %v2000_v1  ;;  %1853 = vmatprep.subr.bf16.mxu1 %v2000_v1 }
  0x3f   : > { %726 = vmatpush1.bf16.msra.mxu0 %v1894_v17  ;;  %1869 = vmatpush1.bf16.msra.mxu1 %v1894_v17  ;;  %v2184_v17 = vld [vmem:[%s2293_s2] ss:$0 sm:$0xff] }
  0x40   : > { %727 = vmatprep.subr.bf16.mxu0 %v2000_v1  ;;  %1854 = vmatprep.subr.bf16.mxu1 %v2000_v1  ;;  %v1968_v1 = vld [vmem:[%s2058_s28 + $0xc4] ss:$8 sps:$4 sm:$0xff]  }
  0x43   : > { %728 = vmatpush1.bf16.msra.mxu0 %v1895_v18  ;;  %1870 = vmatpush1.bf16.msra.mxu1 %v1895_v18 }
  0x46   : > { %730 = vmatmul.mubr.bf16.vlgmr.msra.gmra.mrb[0].mxu0 %v1896_v19  ;;  %858 = vmatmul.mubr.bf16.vlgmr.msra.gmra.mrb[0].mxu1 %v1899_v20 }
  0x47   : > { %737 = vmatprep.mubr.bf16.mxu0 %v1902_v21  ;;  %865 = vmatprep.mubr.bf16.mxu1 %v1904_v22 }
  0x4e   : > { %738 = vmatmul.mubr.bf16.gmra.mrb[4].mxu0 %v1906_v23  ;;  %866 = vmatmul.mubr.bf16.gmra.mrb[4].mxu1 %v1907_v24 }
  0x4f   : > { %745 = vmatprep.mubr.bf16.mxu0 %v1908_v25  ;;  %873 = vmatprep.mubr.bf16.mxu1 %v1910_v26 }
  0x56   : > { %746 = vmatmul.mubr.bf16.gmra.mrb[8].mxu0 %v1912_v27  ;;  %874 = vmatmul.mubr.bf16.gmra.mrb[8].mxu1 %v1913_v28 }
  0x57   : > { %753 = vmatprep.mubr.bf16.mxu0 %v1914_v29  ;;  %881 = vmatprep.mubr.bf16.mxu1 %v1916_v30 }
  0x5e   : > { %754 = vmatmul.mubr.bf16.gmra.mrb[12].mxu0 %v1918_v31  ;;  %882 = vmatmul.mubr.bf16.gmra.mrb[12].mxu1 %v1919_v32 }
  0x5f   : > { %761 = vmatprep.mubr.bf16.mxu0 %v1920_v33  ;;  %889 = vmatprep.mubr.bf16.mxu1 %v1922_v34 }
  0x66   : > { %762 = vmatmul.mubr.bf16.gmra.mrb[16].mxu0 %v1924_v35  ;;  %890 = vmatmul.mubr.bf16.gmra.mrb[16].mxu1 %v1925_v36 }
  0x67   : > { %769 = vmatprep.mubr.bf16.mxu0 %v1926_v37  ;;  %897 = vmatprep.mubr.bf16.mxu1 %v1928_v38 }
  0x6e   : > { %770 = vmatmul.mubr.bf16.gmra.mrb[20].mxu0 %v1930_v39  ;;  %898 = vmatmul.mubr.bf16.gmra.mrb[20].mxu1 %v1931_v40 }
  0x6f   : > { %777 = vmatprep.mubr.bf16.mxu0 %v1932_v41  ;;  %905 = vmatprep.mubr.bf16.mxu1 %v1934_v42 }
  0x76   : > { %778 = vmatmul.mubr.bf16.gmra.mrb[24].mxu0 %v1936_v43  ;;  %906 = vmatmul.mubr.bf16.gmra.mrb[24].mxu1 %v1937_v44 }
  0x77   : > { %785 = vmatprep.mubr.bf16.mxu0 %v1938_v45  ;;  %913 = vmatprep.mubr.bf16.mxu1 %v1940_v46 }
  0x7e   : > { %786 = vmatmul.mubr.bf16.gmra.mrb[28].mxu0 %v1942_v47  ;;  %914 = vmatmul.mubr.bf16.gmra.mrb[28].mxu1 %v1943_v48 }
  0x7f   : > { %793 = vmatprep.mubr.bf16.mxu0 %v1944_v49  ;;  %921 = vmatprep.mubr.bf16.mxu1 %v1946_v50 }
  0x86   : > { %794 = vmatmul.mubr.bf16.gmra.mrb[32].mxu0 %v1948_v51  ;;  %922 = vmatmul.mubr.bf16.gmra.mrb[32].mxu1 %v1949_v52 }
  0x87   : > { %801 = vmatprep.mubr.bf16.mxu0 %v1950_v53  ;;  %929 = vmatprep.mubr.bf16.mxu1 %v1952_v54 }
  0x8e   : > { %802 = vmatmul.mubr.bf16.gmra.mrb[36].mxu0 %v1954_v55  ;;  %930 = vmatmul.mubr.bf16.gmra.mrb[36].mxu1 %v1955_v56 }
  0x8f   : > { %809 = vmatprep.mubr.bf16.mxu0 %v1956_v57  ;;  %937 = vmatprep.mubr.bf16.mxu1 %v1958_v58 }
  0x96   : > { %810 = vmatmul.mubr.bf16.gmra.mrb[40].mxu0 %v1960_v59  ;;  %938 = vmatmul.mubr.bf16.gmra.mrb[40].mxu1 %v1961_v60 }
  0x97   : > { %817 = vmatprep.mubr.bf16.mxu0 %v1962_v61  ;;  %945 = vmatprep.mubr.bf16.mxu1 %v1964_v62 }
  0x9e   : > { %818 = vmatmul.mubr.bf16.gmra.mrb[44].mxu0 %v1966_v63  ;;  %946 = vmatmul.mubr.bf16.gmra.mrb[44].mxu1 %v1967_v0 }
  0x9f   : > { %825 = vmatprep.mubr.bf16.mxu0 %v1968_v1  ;;  %953 = vmatprep.mubr.bf16.mxu1 %v1970_v2 }
  0xa6   : > { %826 = vmatmul.mubr.bf16.gmra.mrb[48].mxu0 %v1972_v3  ;;  %954 = vmatmul.mubr.bf16.gmra.mrb[48].mxu1 %v1973_v4 }
  0xa7   : > { %833 = vmatprep.mubr.bf16.mxu0 %v1974_v5  ;;  %961 = vmatprep.mubr.bf16.mxu1 %v1976_v6 }
  0xae   : > { %834 = vmatmul.mubr.bf16.gmra.mrb[52].mxu0 %v1978_v7  ;;  %962 = vmatmul.mubr.bf16.gmra.mrb[52].mxu1 %v1979_v8 }
  0xaf   : > { %841 = vmatprep.mubr.bf16.mxu0 %v1980_v9  ;;  %969 = vmatprep.mubr.bf16.mxu1 %v1982_v10 }
  0xb6   : > { %842 = vmatmul.mubr.bf16.gmra.mrb[56].mxu0 %v1984_v11  ;;  %970 = vmatmul.mubr.bf16.gmra.mrb[56].mxu1 %v1985_v12 }
  0xb7   : > { %849 = vmatprep.mubr.bf16.mxu0 %v1986_v13  ;;  %977 = vmatprep.mubr.bf16.mxu1 %v1988_v14 }
  0xbe   : > { %850 = vmatmul.mubr.bf16.gmra.mrb[60].mxu0 %v1990_v15  ;;  %978 = vmatmul.mubr.bf16.gmra.mrb[60].mxu1 %v1991_v16 }
 0x119   : > { %v731_v18 = vpop.f32.mrb[0].mxu0  ;;  %v859_v19 = vpop.f32.mrb[0].mxu1 }
 0x11a   : > { %v732_v20 = vadd.f32 %v2184_v17, %v731_v18  ;;  %v860_v21 = vadd.f32 %v2184_v17, %v859_v19  ;;  %v733_v22 = vpop.f32.mrb[1].mxu0  ;;  %v861_v23 = vpop.f32.mrb[1].mxu1 }
 0x11b   : > { %v734_v24 = vpop.f32.mrb[2].mxu0  ;;  %v862_v25 = vpop.f32.mrb[2].mxu1 }
 0x11c   : > { %v735_v26 = vadd.f32 %v2184_v17, %v734_v24  ;;  %v863_v27 = vadd.f32 %v2184_v17, %v862_v25  ;;  %v736_v28 = vpop.f32.mrb[3].mxu0  ;;  %v864_v29 = vpop.f32.mrb[3].mxu1  ;;  %v986_v30 = vmax.f32 %v732_v20, 0.0  ;;  %v1018_v31 = vmax.f32 %v860_v21, 0.0 }
 0x11e   : > { %v987_v32 = vmax.f32 %v735_v26, 0.0  ;;  %v1019_v33 = vmax.f32 %v863_v27, 0.0 }
 0x120   : > { %v1651_v34 = vpack.c.bf16 %v987_v32, %v986_v30  ;;  %v1731_v35 = vpack.c.bf16 %v1019_v33, %v1018_v31 }
 0x121   : > { %v739_v36 = vpop.f32.mrb[4].mxu0  ;;  %v867_v37 = vpop.f32.mrb[4].mxu1 }
 0x122   : > { %1652 = vst [vmem:[%s2194_s4] sm:$0xff] %v1651_v34   ;;  %1823 = vst [vmem:[%s2194_s4 + $0x80] sm:$0xff] %v1731_v35   ;;  %v740_v38 = vadd.f32 %v2184_v17, %v739_v36  ;;  %v868_v39 = vadd.f32 %v2184_v17, %v867_v37  ;;  %v741_v40 = vpop.f32.mrb[5].mxu0  ;;  %v869_v41 = vpop.f32.mrb[5].mxu1 }
 0x123   : > { %v742_v42 = vpop.f32.mrb[6].mxu0  ;;  %v870_v43 = vpop.f32.mrb[6].mxu1 }
 0x124   : > { %v743_v44 = vadd.f32 %v2184_v17, %v742_v42  ;;  %v871_v45 = vadd.f32 %v2184_v17, %v870_v43  ;;  %v744_v46 = vpop.f32.mrb[7].mxu0  ;;  %v872_v47 = vpop.f32.mrb[7].mxu1  ;;  %v988_v48 = vmax.f32 %v740_v38, 0.0  ;;  %v1020_v49 = vmax.f32 %v868_v39, 0.0 }
 0x126   : > { %v989_v50 = vmax.f32 %v743_v44, 0.0  ;;  %v1021_v51 = vmax.f32 %v871_v45, 0.0 }
 0x128   : > { %v1656_v52 = vpack.c.bf16 %v989_v50, %v988_v48  ;;  %v1736_v53 = vpack.c.bf16 %v1021_v51, %v1020_v49 }
 0x129   : > { %v747_v54 = vpop.f32.mrb[8].mxu0  ;;  %v875_v55 = vpop.f32.mrb[8].mxu1 }
 0x12a   : > { %1808 = vst [vmem:[%s2194_s4 + $0x8] sm:$0xff] %v1656_v52   ;;  %1824 = vst [vmem:[%s2194_s4 + $0x88] sm:$0xff] %v1736_v53   ;;  %v748_v56 = vadd.f32 %v2184_v17, %v747_v54  ;;  %v876_v57 = vadd.f32 %v2184_v17, %v875_v55  ;;  %v749_v58 = vpop.f32.mrb[9].mxu0  ;;  %v877_v59 = vpop.f32.mrb[9].mxu1 }
 0x12b   : > { %v750_v60 = vpop.f32.mrb[10].mxu0  ;;  %v878_v61 = vpop.f32.mrb[10].mxu1 }
 0x12c   : > { %v751_v62 = vadd.f32 %v2184_v17, %v750_v60  ;;  %v879_v63 = vadd.f32 %v2184_v17, %v878_v61  ;;  %v752_v0 = vpop.f32.mrb[11].mxu0  ;;  %v880_v1 = vpop.f32.mrb[11].mxu1  ;;  %v990_v2 = vmax.f32 %v748_v56, 0.0  ;;  %v1022_v3 = vmax.f32 %v876_v57, 0.0 }
 0x12e   : > { %v991_v4 = vmax.f32 %v751_v62, 0.0  ;;  %v1023_v5 = vmax.f32 %v879_v63, 0.0 }
 0x130   : > { %v1661_v6 = vpack.c.bf16 %v991_v4, %v990_v2  ;;  %v1741_v7 = vpack.c.bf16 %v1023_v5, %v1022_v3 }
 0x131   : > { %v755_v8 = vpop.f32.mrb[12].mxu0  ;;  %v883_v9 = vpop.f32.mrb[12].mxu1 }
 0x132   : > { %1809 = vst [vmem:[%s2194_s4 + $0x10] sm:$0xff] %v1661_v6   ;;  %1825 = vst [vmem:[%s2194_s4 + $0x90] sm:$0xff] %v1741_v7   ;;  %v756_v10 = vadd.f32 %v2184_v17, %v755_v8  ;;  %v884_v11 = vadd.f32 %v2184_v17, %v883_v9  ;;  %v757_v12 = vpop.f32.mrb[13].mxu0  ;;  %v885_v13 = vpop.f32.mrb[13].mxu1 }
 0x133   : > { %v758_v14 = vpop.f32.mrb[14].mxu0  ;;  %v886_v15 = vpop.f32.mrb[14].mxu1 }
 0x134   : > { %v759_v16 = vadd.f32 %v2184_v17, %v758_v14  ;;  %v887_v18 = vadd.f32 %v2184_v17, %v886_v15  ;;  %v760_v19 = vpop.f32.mrb[15].mxu0  ;;  %v888_v20 = vpop.f32.mrb[15].mxu1  ;;  %v992_v21 = vmax.f32 %v756_v10, 0.0  ;;  %v1024_v22 = vmax.f32 %v884_v11, 0.0 }
 0x136   : > { %v993_v23 = vmax.f32 %v759_v16, 0.0  ;;  %v1025_v24 = vmax.f32 %v887_v18, 0.0 }
 0x138   : > { %v1666_v25 = vpack.c.bf16 %v993_v23, %v992_v21  ;;  %v1746_v26 = vpack.c.bf16 %v1025_v24, %v1024_v22 }
 0x139   : > { %v763_v27 = vpop.f32.mrb[16].mxu0  ;;  %v891_v28 = vpop.f32.mrb[16].mxu1 }
 0x13a   : > { %1810 = vst [vmem:[%s2194_s4 + $0x18] sm:$0xff] %v1666_v25   ;;  %1826 = vst [vmem:[%s2194_s4 + $0x98] sm:$0xff] %v1746_v26   ;;  %v764_v29 = vadd.f32 %v2184_v17, %v763_v27  ;;  %v892_v30 = vadd.f32 %v2184_v17, %v891_v28  ;;  %v765_v31 = vpop.f32.mrb[17].mxu0  ;;  %v893_v32 = vpop.f32.mrb[17].mxu1 }
 0x13b   : > { %v766_v33 = vpop.f32.mrb[18].mxu0  ;;  %v894_v34 = vpop.f32.mrb[18].mxu1 }
 0x13c   : > { %v767_v35 = vadd.f32 %v2184_v17, %v766_v33  ;;  %v895_v36 = vadd.f32 %v2184_v17, %v894_v34  ;;  %v768_v37 = vpop.f32.mrb[19].mxu0  ;;  %v896_v38 = vpop.f32.mrb[19].mxu1  ;;  %v994_v39 = vmax.f32 %v764_v29, 0.0  ;;  %v1026_v40 = vmax.f32 %v892_v30, 0.0 }
 0x13e   : > { %v995_v41 = vmax.f32 %v767_v35, 0.0  ;;  %v1027_v42 = vmax.f32 %v895_v36, 0.0 }
 0x140   : > { %v1671_v43 = vpack.c.bf16 %v995_v41, %v994_v39  ;;  %v1751_v44 = vpack.c.bf16 %v1027_v42, %v1026_v40 }
 0x141   : > { %v771_v45 = vpop.f32.mrb[20].mxu0  ;;  %v899_v46 = vpop.f32.mrb[20].mxu1 }
 0x142   : > { %1811 = vst [vmem:[%s2194_s4 + $0x20] sm:$0xff] %v1671_v43   ;;  %1827 = vst [vmem:[%s2194_s4 + $0xa0] sm:$0xff] %v1751_v44   ;;  %v772_v47 = vadd.f32 %v2184_v17, %v771_v45  ;;  %v900_v48 = vadd.f32 %v2184_v17, %v899_v46  ;;  %v773_v49 = vpop.f32.mrb[21].mxu0  ;;  %v901_v50 = vpop.f32.mrb[21].mxu1 }
 0x143   : > { %v774_v51 = vpop.f32.mrb[22].mxu0  ;;  %v902_v52 = vpop.f32.mrb[22].mxu1 }
 0x144   : > { %v775_v53 = vadd.f32 %v2184_v17, %v774_v51  ;;  %v903_v54 = vadd.f32 %v2184_v17, %v902_v52  ;;  %v776_v55 = vpop.f32.mrb[23].mxu0  ;;  %v904_v56 = vpop.f32.mrb[23].mxu1  ;;  %v996_v57 = vmax.f32 %v772_v47, 0.0  ;;  %v1028_v58 = vmax.f32 %v900_v48, 0.0 }
 0x146   : > { %v997_v59 = vmax.f32 %v775_v53, 0.0  ;;  %v1029_v60 = vmax.f32 %v903_v54, 0.0 }
 0x148   : > { %v1676_v61 = vpack.c.bf16 %v997_v59, %v996_v57  ;;  %v1756_v62 = vpack.c.bf16 %v1029_v60, %v1028_v58 }
 0x149   : > { %v779_v63 = vpop.f32.mrb[24].mxu0  ;;  %v907_v0 = vpop.f32.mrb[24].mxu1 }
 0x14a   : > { %1812 = vst [vmem:[%s2194_s4 + $0x28] sm:$0xff] %v1676_v61   ;;  %1828 = vst [vmem:[%s2194_s4 + $0xa8] sm:$0xff] %v1756_v62   ;;  %v780_v1 = vadd.f32 %v2184_v17, %v779_v63  ;;  %v908_v2 = vadd.f32 %v2184_v17, %v907_v0  ;;  %v781_v3 = vpop.f32.mrb[25].mxu0  ;;  %v909_v4 = vpop.f32.mrb[25].mxu1 }
 0x14b   : > { %v782_v5 = vpop.f32.mrb[26].mxu0  ;;  %v910_v6 = vpop.f32.mrb[26].mxu1 }
 0x14c   : > { %v783_v7 = vadd.f32 %v2184_v17, %v782_v5  ;;  %v911_v8 = vadd.f32 %v2184_v17, %v910_v6  ;;  %v784_v9 = vpop.f32.mrb[27].mxu0  ;;  %v912_v10 = vpop.f32.mrb[27].mxu1  ;;  %v998_v11 = vmax.f32 %v780_v1, 0.0  ;;  %v1030_v12 = vmax.f32 %v908_v2, 0.0 }
 0x14e   : > { %v999_v13 = vmax.f32 %v783_v7, 0.0  ;;  %v1031_v14 = vmax.f32 %v911_v8, 0.0 }
 0x150   : > { %v1681_v15 = vpack.c.bf16 %v999_v13, %v998_v11  ;;  %v1761_v16 = vpack.c.bf16 %v1031_v14, %v1030_v12 }
 0x151   : > { %v787_v18 = vpop.f32.mrb[28].mxu0  ;;  %v915_v19 = vpop.f32.mrb[28].mxu1 }
 0x152   : > { %1813 = vst [vmem:[%s2194_s4 + $0x30] sm:$0xff] %v1681_v15   ;;  %1829 = vst [vmem:[%s2194_s4 + $0xb0] sm:$0xff] %v1761_v16   ;;  %v788_v20 = vadd.f32 %v2184_v17, %v787_v18  ;;  %v916_v21 = vadd.f32 %v2184_v17, %v915_v19  ;;  %v789_v22 = vpop.f32.mrb[29].mxu0  ;;  %v917_v23 = vpop.f32.mrb[29].mxu1 }
 0x153   : > { %v790_v24 = vpop.f32.mrb[30].mxu0  ;;  %v918_v25 = vpop.f32.mrb[30].mxu1 }
 0x154   : > { %v791_v26 = vadd.f32 %v2184_v17, %v790_v24  ;;  %v919_v27 = vadd.f32 %v2184_v17, %v918_v25  ;;  %v792_v28 = vpop.f32.mrb[31].mxu0  ;;  %v920_v29 = vpop.f32.mrb[31].mxu1  ;;  %v1000_v30 = vmax.f32 %v788_v20, 0.0  ;;  %v1032_v31 = vmax.f32 %v916_v21, 0.0 }
 0x156   : > { %v1001_v32 = vmax.f32 %v791_v26, 0.0  ;;  %v1033_v33 = vmax.f32 %v919_v27, 0.0 }
 0x158   : > { %v1686_v34 = vpack.c.bf16 %v1001_v32, %v1000_v30  ;;  %v1766_v35 = vpack.c.bf16 %v1033_v33, %v1032_v31 }
 0x159   : > { %v795_v36 = vpop.f32.mrb[32].mxu0  ;;  %v923_v37 = vpop.f32.mrb[32].mxu1 }
 0x15a   : > { %1814 = vst [vmem:[%s2194_s4 + $0x38] sm:$0xff] %v1686_v34   ;;  %1830 = vst [vmem:[%s2194_s4 + $0xb8] sm:$0xff] %v1766_v35   ;;  %v796_v38 = vadd.f32 %v2184_v17, %v795_v36  ;;  %v924_v39 = vadd.f32 %v2184_v17, %v923_v37  ;;  %v797_v40 = vpop.f32.mrb[33].mxu0  ;;  %v925_v41 = vpop.f32.mrb[33].mxu1 }
 0x15b   : > { %v798_v42 = vpop.f32.mrb[34].mxu0  ;;  %v926_v43 = vpop.f32.mrb[34].mxu1 }
 0x15c   : > { %v799_v44 = vadd.f32 %v2184_v17, %v798_v42  ;;  %v927_v45 = vadd.f32 %v2184_v17, %v926_v43  ;;  %v800_v46 = vpop.f32.mrb[35].mxu0  ;;  %v928_v47 = vpop.f32.mrb[35].mxu1  ;;  %v1002_v48 = vmax.f32 %v796_v38, 0.0  ;;  %v1034_v49 = vmax.f32 %v924_v39, 0.0 }
 0x15e   : > { %v1003_v50 = vmax.f32 %v799_v44, 0.0  ;;  %v1035_v51 = vmax.f32 %v927_v45, 0.0 }
 0x160   : > { %v1691_v52 = vpack.c.bf16 %v1003_v50, %v1002_v48  ;;  %v1771_v53 = vpack.c.bf16 %v1035_v51, %v1034_v49 }
 0x161   : > { %v803_v54 = vpop.f32.mrb[36].mxu0  ;;  %v931_v55 = vpop.f32.mrb[36].mxu1 }
 0x162   : > { %1815 = vst [vmem:[%s2194_s4 + $0x40] sm:$0xff] %v1691_v52   ;;  %1831 = vst [vmem:[%s2194_s4 + $0xc0] sm:$0xff] %v1771_v53   ;;  %v804_v56 = vadd.f32 %v2184_v17, %v803_v54  ;;  %v932_v57 = vadd.f32 %v2184_v17, %v931_v55  ;;  %v805_v58 = vpop.f32.mrb[37].mxu0  ;;  %v933_v59 = vpop.f32.mrb[37].mxu1 }
 0x163   : > { %v806_v60 = vpop.f32.mrb[38].mxu0  ;;  %v934_v61 = vpop.f32.mrb[38].mxu1 }
 0x164   : > { %v807_v62 = vadd.f32 %v2184_v17, %v806_v60  ;;  %v935_v63 = vadd.f32 %v2184_v17, %v934_v61  ;;  %v808_v0 = vpop.f32.mrb[39].mxu0  ;;  %v936_v1 = vpop.f32.mrb[39].mxu1  ;;  %v1004_v2 = vmax.f32 %v804_v56, 0.0  ;;  %v1036_v3 = vmax.f32 %v932_v57, 0.0 }
 0x166   : > { %v1005_v4 = vmax.f32 %v807_v62, 0.0  ;;  %v1037_v5 = vmax.f32 %v935_v63, 0.0 }
 0x168   : > { %v1696_v6 = vpack.c.bf16 %v1005_v4, %v1004_v2  ;;  %v1776_v7 = vpack.c.bf16 %v1037_v5, %v1036_v3 }
 0x169   : > { %v811_v8 = vpop.f32.mrb[40].mxu0  ;;  %v939_v9 = vpop.f32.mrb[40].mxu1 }
 0x16a   : > { %1816 = vst [vmem:[%s2194_s4 + $0x48] sm:$0xff] %v1696_v6   ;;  %1832 = vst [vmem:[%s2194_s4 + $0xc8] sm:$0xff] %v1776_v7   ;;  %v812_v10 = vadd.f32 %v2184_v17, %v811_v8  ;;  %v940_v11 = vadd.f32 %v2184_v17, %v939_v9  ;;  %v813_v12 = vpop.f32.mrb[41].mxu0  ;;  %v941_v13 = vpop.f32.mrb[41].mxu1 }
 0x16b   : > { %v814_v14 = vpop.f32.mrb[42].mxu0  ;;  %v942_v15 = vpop.f32.mrb[42].mxu1 }
 0x16c   : > { %v815_v16 = vadd.f32 %v2184_v17, %v814_v14  ;;  %v943_v18 = vadd.f32 %v2184_v17, %v942_v15  ;;  %v816_v19 = vpop.f32.mrb[43].mxu0  ;;  %v944_v20 = vpop.f32.mrb[43].mxu1  ;;  %v1006_v21 = vmax.f32 %v812_v10, 0.0  ;;  %v1038_v22 = vmax.f32 %v940_v11, 0.0 }
 0x16e   : > { %v1007_v23 = vmax.f32 %v815_v16, 0.0  ;;  %v1039_v24 = vmax.f32 %v943_v18, 0.0 }
 0x170   : > { %v1701_v25 = vpack.c.bf16 %v1007_v23, %v1006_v21  ;;  %v1781_v26 = vpack.c.bf16 %v1039_v24, %v1038_v22 }
 0x171   : > { %v819_v27 = vpop.f32.mrb[44].mxu0  ;;  %v947_v28 = vpop.f32.mrb[44].mxu1 }
 0x172   : > { %1817 = vst [vmem:[%s2194_s4 + $0x50] sm:$0xff] %v1701_v25   ;;  %1833 = vst [vmem:[%s2194_s4 + $0xd0] sm:$0xff] %v1781_v26   ;;  %v820_v29 = vadd.f32 %v2184_v17, %v819_v27  ;;  %v948_v30 = vadd.f32 %v2184_v17, %v947_v28  ;;  %v821_v31 = vpop.f32.mrb[45].mxu0  ;;  %v949_v32 = vpop.f32.mrb[45].mxu1 }
 0x173   : > { %v822_v33 = vpop.f32.mrb[46].mxu0  ;;  %v950_v34 = vpop.f32.mrb[46].mxu1 }
 0x174   : > { %v823_v35 = vadd.f32 %v2184_v17, %v822_v33  ;;  %v951_v36 = vadd.f32 %v2184_v17, %v950_v34  ;;  %v824_v37 = vpop.f32.mrb[47].mxu0  ;;  %v952_v38 = vpop.f32.mrb[47].mxu1  ;;  %v1008_v39 = vmax.f32 %v820_v29, 0.0  ;;  %v1040_v40 = vmax.f32 %v948_v30, 0.0 }
 0x176   : > { %v1009_v41 = vmax.f32 %v823_v35, 0.0  ;;  %v1041_v42 = vmax.f32 %v951_v36, 0.0 }
 0x178   : > { %v1706_v43 = vpack.c.bf16 %v1009_v41, %v1008_v39  ;;  %v1786_v44 = vpack.c.bf16 %v1041_v42, %v1040_v40 }
 0x179   : > { %v827_v45 = vpop.f32.mrb[48].mxu0  ;;  %v955_v46 = vpop.f32.mrb[48].mxu1 }
 0x17a   : > { %1818 = vst [vmem:[%s2194_s4 + $0x58] sm:$0xff] %v1706_v43   ;;  %1834 = vst [vmem:[%s2194_s4 + $0xd8] sm:$0xff] %v1786_v44   ;;  %v828_v47 = vadd.f32 %v2184_v17, %v827_v45  ;;  %v956_v48 = vadd.f32 %v2184_v17, %v955_v46  ;;  %v829_v49 = vpop.f32.mrb[49].mxu0  ;;  %v957_v50 = vpop.f32.mrb[49].mxu1 }
 0x17b   : > { %v830_v51 = vpop.f32.mrb[50].mxu0  ;;  %v958_v52 = vpop.f32.mrb[50].mxu1 }
 0x17c   : > { %v831_v53 = vadd.f32 %v2184_v17, %v830_v51  ;;  %v959_v54 = vadd.f32 %v2184_v17, %v958_v52  ;;  %v832_v55 = vpop.f32.mrb[51].mxu0  ;;  %v960_v56 = vpop.f32.mrb[51].mxu1  ;;  %v1010_v57 = vmax.f32 %v828_v47, 0.0  ;;  %v1042_v58 = vmax.f32 %v956_v48, 0.0 }
 0x17e   : > { %v1011_v59 = vmax.f32 %v831_v53, 0.0  ;;  %v1043_v60 = vmax.f32 %v959_v54, 0.0 }
 0x180   : > { %v1711_v61 = vpack.c.bf16 %v1011_v59, %v1010_v57  ;;  %v1791_v62 = vpack.c.bf16 %v1043_v60, %v1042_v58 }
 0x181   : > { %v835_v63 = vpop.f32.mrb[52].mxu0  ;;  %v963_v0 = vpop.f32.mrb[52].mxu1 }
 0x182   : > { %1819 = vst [vmem:[%s2194_s4 + $0x60] sm:$0xff] %v1711_v61   ;;  %1835 = vst [vmem:[%s2194_s4 + $0xe0] sm:$0xff] %v1791_v62   ;;  %v836_v1 = vadd.f32 %v2184_v17, %v835_v63  ;;  %v964_v2 = vadd.f32 %v2184_v17, %v963_v0  ;;  %v837_v3 = vpop.f32.mrb[53].mxu0  ;;  %v965_v4 = vpop.f32.mrb[53].mxu1 }
 0x183   : > { %v838_v5 = vpop.f32.mrb[54].mxu0  ;;  %v966_v6 = vpop.f32.mrb[54].mxu1 }
 0x184   : > { %v839_v7 = vadd.f32 %v2184_v17, %v838_v5  ;;  %v967_v8 = vadd.f32 %v2184_v17, %v966_v6  ;;  %v840_v9 = vpop.f32.mrb[55].mxu0  ;;  %v968_v10 = vpop.f32.mrb[55].mxu1  ;;  %v1012_v11 = vmax.f32 %v836_v1, 0.0  ;;  %v1044_v12 = vmax.f32 %v964_v2, 0.0 }
 0x186   : > { %v1013_v13 = vmax.f32 %v839_v7, 0.0  ;;  %v1045_v14 = vmax.f32 %v967_v8, 0.0 }
 0x188   : > { %v1716_v15 = vpack.c.bf16 %v1013_v13, %v1012_v11  ;;  %v1796_v16 = vpack.c.bf16 %v1045_v14, %v1044_v12 }
 0x189   : > { %v843_v18 = vpop.f32.mrb[56].mxu0  ;;  %v971_v19 = vpop.f32.mrb[56].mxu1 }
 0x18a   : > { %1820 = vst [vmem:[%s2194_s4 + $0x68] sm:$0xff] %v1716_v15   ;;  %1836 = vst [vmem:[%s2194_s4 + $0xe8] sm:$0xff] %v1796_v16   ;;  %v844_v20 = vadd.f32 %v2184_v17, %v843_v18  ;;  %v972_v21 = vadd.f32 %v2184_v17, %v971_v19  ;;  %v845_v22 = vpop.f32.mrb[57].mxu0  ;;  %v973_v23 = vpop.f32.mrb[57].mxu1 }
 0x18b   : > { %v846_v24 = vpop.f32.mrb[58].mxu0  ;;  %v974_v25 = vpop.f32.mrb[58].mxu1 }
 0x18c   : > { %v847_v26 = vadd.f32 %v2184_v17, %v846_v24  ;;  %v975_v27 = vadd.f32 %v2184_v17, %v974_v25  ;;  %v848_v28 = vpop.f32.mrb[59].mxu0  ;;  %v976_v29 = vpop.f32.mrb[59].mxu1  ;;  %v1014_v30 = vmax.f32 %v844_v20, 0.0  ;;  %v1046_v31 = vmax.f32 %v972_v21, 0.0 }
 0x18e   : > { %v1015_v32 = vmax.f32 %v847_v26, 0.0  ;;  %v1047_v33 = vmax.f32 %v975_v27, 0.0 }
 0x190   : > { %v1721_v34 = vpack.c.bf16 %v1015_v32, %v1014_v30  ;;  %v1801_v35 = vpack.c.bf16 %v1047_v33, %v1046_v31 }
 0x191   : > { %v851_v36 = vpop.f32.mrb[60].mxu0  ;;  %v979_v37 = vpop.f32.mrb[60].mxu1 }
 0x192   : > { %1821 = vst [vmem:[%s2194_s4 + $0x70] sm:$0xff] %v1721_v34   ;;  %1837 = vst [vmem:[%s2194_s4 + $0xf0] sm:$0xff] %v1801_v35   ;;  %v852_v38 = vadd.f32 %v2184_v17, %v851_v36  ;;  %v980_v39 = vadd.f32 %v2184_v17, %v979_v37  ;;  %v853_v40 = vpop.f32.mrb[61].mxu0  ;;  %v981_v41 = vpop.f32.mrb[61].mxu1 }
 0x193   : > { %v854_v42 = vpop.f32.mrb[62].mxu0  ;;  %v982_v43 = vpop.f32.mrb[62].mxu1 }
 0x194   : > { %v855_v44 = vadd.f32 %v2184_v17, %v854_v42  ;;  %v983_v45 = vadd.f32 %v2184_v17, %v982_v43  ;;  %v856_v46 = vpop.f32.mrb[63].mxu0  ;;  %v984_v47 = vpop.f32.mrb[63].mxu1  ;;  %v1016_v48 = vmax.f32 %v852_v38, 0.0  ;;  %v1048_v49 = vmax.f32 %v980_v39, 0.0 }
 0x196   : > { %v1017_v50 = vmax.f32 %v855_v44, 0.0  ;;  %v1049_v51 = vmax.f32 %v983_v45, 0.0 }
 0x198   : > { %v1726_v52 = vpack.c.bf16 %v1017_v50, %v1016_v48  ;;  %v1806_v53 = vpack.c.bf16 %v1049_v51, %v1048_v49 }
 0x19a   : > { %1822 = vst [vmem:[%s2194_s4 + $0x78] sm:$0xff] %v1726_v52   ;;  %1838 = vst [vmem:[%s2194_s4 + $0xf8] sm:$0xff] %v1806_v53  }
 0x19b PF: > { %s13_s12 = sadd.s32 1, %s1998_s12  }
 0x19c   : > { %p10_p4 = scmp.ge.s32.totalorder %s13_s12, 4  }
 0x19e   :  { %12 = sbr.rel (!%p10_p4) target bundleno = 1 (0x1), region = 62 }

// kernel: _lambda_.5
= control target key start
LH: loop header
LB: loop body
LE: loop exit
PB: predicated region body
PF: predicated region fallthrough
CT: control target
= control target key end

     0   :  { %s1474_s1 = inlined_call_operand.vmem [shape: bf16[512,128], index: 1, kind: input, shape index: {}]   ;;  %s1475_s0 = inlined_call_operand.vmem [shape: bf16[144,512], index: 0, kind: input, shape index: {}]   ;;  %s1476_s2 = inlined_call_operand.vmem [shape: f32[1,128], index: 2, kind: input, shape index: {}]   ;;  %s1477_s3 = inlined_call_operand.vmem [shape: bf16[144,128], index: 3, kind: output, shape index: {}]  }
   0x1   :  { %v1114_v0 = vld [vmem:[%s1474_s1 + $0x40] sm:$0xff]   ;;  %v1118_v4 = vld [vmem:[%s1474_s1 + $0x48] sm:$0xff]   ;;  %v1122_v8 = vld [vmem:[%s1474_s1 + $0x50] sm:$0xff]  }
   0x2   :  { %v1115_v1 = vld [vmem:[%s1474_s1 + $0xc0] sm:$0xff]   ;;  %974 = vmatprep.subr.bf16.mxu0 %v1114_v0  ;;  %v1119_v5 = vld [vmem:[%s1474_s1 + $0xc8] sm:$0xff]   ;;  %v1123_v9 = vld [vmem:[%s1474_s1 + $0xd0] sm:$0xff]  }
   0x3   :  { %v1116_v2 = vld [vmem:[%s1474_s1] sm:$0xff]   ;;  %1044 = vmatprep.subr.bf16.mxu1 %v1115_v1  ;;  %v1120_v6 = vld [vmem:[%s1474_s1 + $0x8] sm:$0xff]   ;;  %v1124_v10 = vld [vmem:[%s1474_s1 + $0x10] sm:$0xff]  }
   0x4   :  { %v1117_v3 = vld [vmem:[%s1474_s1 + $0x80] sm:$0xff]   ;;  %975 = vmatpush3.bf16.msra.mxu0 %v1116_v2  ;;  %v1121_v7 = vld [vmem:[%s1474_s1 + $0x88] sm:$0xff]   ;;  %v1125_v11 = vld [vmem:[%s1474_s1 + $0x90] sm:$0xff]  }
   0x5   :  { %1045 = vmatpush3.bf16.msra.mxu1 %v1117_v3  ;;  %976 = vmatprep.subr.bf16.mxu0 %v1118_v4  ;;  %v1126_v12 = vld [vmem:[%s1474_s1 + $0x58] sm:$0xff]   ;;  %v1130_v16 = vld [vmem:[%s1474_s1 + $0x60] sm:$0xff]   ;;  %v1134_v20 = vld [vmem:[%s1474_s1 + $0x68] sm:$0xff]  }
   0x6   :  { %1046 = vmatprep.subr.bf16.mxu1 %v1119_v5  ;;  %v1127_v13 = vld [vmem:[%s1474_s1 + $0xd8] sm:$0xff]   ;;  %v1131_v17 = vld [vmem:[%s1474_s1 + $0xe0] sm:$0xff]   ;;  %v1135_v21 = vld [vmem:[%s1474_s1 + $0xe8] sm:$0xff]  }
   0x7   :  { %v1128_v14 = vld [vmem:[%s1474_s1 + $0x18] sm:$0xff]   ;;  %v1132_v18 = vld [vmem:[%s1474_s1 + $0x20] sm:$0xff]   ;;  %v1136_v22 = vld [vmem:[%s1474_s1 + $0x28] sm:$0xff]  }
   0x8   :  { %977 = vmatpush3.bf16.msra.mxu0 %v1120_v6  ;;  %v1129_v15 = vld [vmem:[%s1474_s1 + $0x98] sm:$0xff]   ;;  %v1133_v19 = vld [vmem:[%s1474_s1 + $0xa0] sm:$0xff]   ;;  %v1137_v23 = vld [vmem:[%s1474_s1 + $0xa8] sm:$0xff]  }
   0x9   :  { %1047 = vmatpush3.bf16.msra.mxu1 %v1121_v7  ;;  %978 = vmatprep.subr.bf16.mxu0 %v1122_v8  ;;  %v1138_v24 = vld [vmem:[%s1474_s1 + $0x70] sm:$0xff]   ;;  %v1142_v28 = vld [vmem:[%s1474_s1 + $0x78] sm:$0xff]   ;;  %v1427_v6 = vld [vmem:[%s1476_s2] ss:$0 sm:$0xff] }
   0xa   :  { %1048 = vmatprep.subr.bf16.mxu1 %v1123_v9  ;;  %v1139_v25 = vld [vmem:[%s1474_s1 + $0xf0] sm:$0xff]   ;;  %v1143_v29 = vld [vmem:[%s1474_s1 + $0xf8] sm:$0xff]  }
   0xb   :  { %v1140_v26 = vld [vmem:[%s1474_s1 + $0x30] sm:$0xff]   ;;  %v1144_v30 = vld [vmem:[%s1474_s1 + $0x38] sm:$0xff]  }
   0xc   :  { %979 = vmatpush3.bf16.msra.mxu0 %v1124_v10  ;;  %v1141_v27 = vld [vmem:[%s1474_s1 + $0xb0] sm:$0xff]   ;;  %v1145_v31 = vld [vmem:[%s1474_s1 + $0xb8] sm:$0xff]  }
   0xd   :  { %1049 = vmatpush3.bf16.msra.mxu1 %v1125_v11  ;;  %980 = vmatprep.subr.bf16.mxu0 %v1126_v12  ;;  %v1146_v32 = vld [vmem:[%s1475_s0] ss:$16 sps:$4 sm:$0xff]   ;;  %v1148_v33 = vld [vmem:[%s1475_s0 + $0x4] ss:$16 sps:$4 sm:$0xff]   ;;  %v1149_v34 = vld [vmem:[%s1475_s0 + $0x8] ss:$16 sps:$4 sm:$0xff]  }
   0xe   :  { %1050 = vmatprep.subr.bf16.mxu1 %v1127_v13  ;;  %v1151_v35 = vld [vmem:[%s1475_s0 + $0xc] ss:$16 sps:$4 sm:$0xff]   ;;  %526 = vmatprep.mubr.bf16.mxu0 %v1148_v33  ;;  %v1152_v36 = vld [vmem:[%s1475_s0 + $0x24] ss:$16 sps:$4 sm:$0xff]   ;;  %v1156_v38 = vld [vmem:[%s1475_s0 + $0x20] ss:$16 sps:$4 sm:$0xff]  }
   0xf   :  { %631 = vmatprep.mubr.bf16.mxu1 %v1151_v35  ;;  %v1154_v37 = vld [vmem:[%s1475_s0 + $0x2c] ss:$16 sps:$4 sm:$0xff]   ;;  %v1157_v39 = vld [vmem:[%s1475_s0 + $0x28] ss:$16 sps:$4 sm:$0xff]   ;;  %v1158_v40 = vld [vmem:[%s1475_s0 + $0x44] ss:$16 sps:$4 sm:$0xff]  }
  0x10   :  { %981 = vmatpush3.bf16.msra.mxu0 %v1128_v14  ;;  %v1160_v41 = vld [vmem:[%s1475_s0 + $0x4c] ss:$16 sps:$4 sm:$0xff]   ;;  %v1162_v42 = vld [vmem:[%s1475_s0 + $0x40] ss:$16 sps:$4 sm:$0xff]   ;;  %v1163_v43 = vld [vmem:[%s1475_s0 + $0x48] ss:$16 sps:$4 sm:$0xff]  }
  0x11   :  { %1051 = vmatpush3.bf16.msra.mxu1 %v1129_v15  ;;  %982 = vmatprep.subr.bf16.mxu0 %v1130_v16  ;;  %v1164_v44 = vld [vmem:[%s1475_s0 + $0x64] ss:$16 sps:$4 sm:$0xff]   ;;  %v1166_v45 = vld [vmem:[%s1475_s0 + $0x6c] ss:$16 sps:$4 sm:$0xff]   ;;  %v1168_v46 = vld [vmem:[%s1475_s0 + $0x60] ss:$16 sps:$4 sm:$0xff]  }
  0x12   :  { %1052 = vmatprep.subr.bf16.mxu1 %v1131_v17  ;;  %v1169_v47 = vld [vmem:[%s1475_s0 + $0x68] ss:$16 sps:$4 sm:$0xff]   ;;  %v1170_v48 = vld [vmem:[%s1475_s0 + $0x84] ss:$16 sps:$4 sm:$0xff]   ;;  %v1172_v49 = vld [vmem:[%s1475_s0 + $0x8c] ss:$16 sps:$4 sm:$0xff]  }
  0x13   :  { %v1174_v50 = vld [vmem:[%s1475_s0 + $0x80] ss:$16 sps:$4 sm:$0xff]   ;;  %v1175_v51 = vld [vmem:[%s1475_s0 + $0x88] ss:$16 sps:$4 sm:$0xff]   ;;  %v1176_v52 = vld [vmem:[%s1475_s0 + $0xa4] ss:$16 sps:$4 sm:$0xff]  }
  0x14   :  { %983 = vmatpush3.bf16.msra.mxu0 %v1132_v18  ;;  %v1178_v53 = vld [vmem:[%s1475_s0 + $0xac] ss:$16 sps:$4 sm:$0xff]   ;;  %v1180_v54 = vld [vmem:[%s1475_s0 + $0xa0] ss:$16 sps:$4 sm:$0xff]   ;;  %v1181_v55 = vld [vmem:[%s1475_s0 + $0xa8] ss:$16 sps:$4 sm:$0xff]  }
  0x15   :  { %1053 = vmatpush3.bf16.msra.mxu1 %v1133_v19  ;;  %984 = vmatprep.subr.bf16.mxu0 %v1134_v20  ;;  %v1182_v56 = vld [vmem:[%s1475_s0 + $0xc4] ss:$16 sps:$4 sm:$0xff]   ;;  %v1184_v57 = vld [vmem:[%s1475_s0 + $0xcc] ss:$16 sps:$4 sm:$0xff]   ;;  %v1186_v58 = vld [vmem:[%s1475_s0 + $0xc0] ss:$16 sps:$4 sm:$0xff]  }
  0x16   :  { %1054 = vmatprep.subr.bf16.mxu1 %v1135_v21  ;;  %v1187_v59 = vld [vmem:[%s1475_s0 + $0xc8] ss:$16 sps:$4 sm:$0xff]   ;;  %v1188_v60 = vld [vmem:[%s1475_s0 + $0xe4] ss:$16 sps:$4 sm:$0xff]   ;;  %v1190_v61 = vld [vmem:[%s1475_s0 + $0xec] ss:$16 sps:$4 sm:$0xff]  }
  0x17   :  { %v1192_v62 = vld [vmem:[%s1475_s0 + $0xe0] ss:$16 sps:$4 sm:$0xff]   ;;  %v1193_v63 = vld [vmem:[%s1475_s0 + $0xe8] ss:$16 sps:$4 sm:$0xff]   ;;  %v1194_v0 = vld [vmem:[%s1475_s0 + $0x104] ss:$16 sps:$4 sm:$0xff]  }
  0x18   :  { %985 = vmatpush3.bf16.msra.mxu0 %v1136_v22  ;;  %v1196_v1 = vld [vmem:[%s1475_s0 + $0x10c] ss:$16 sps:$4 sm:$0xff]   ;;  %v1198_v2 = vld [vmem:[%s1475_s0 + $0x100] ss:$16 sps:$4 sm:$0xff]   ;;  %v1199_v3 = vld [vmem:[%s1475_s0 + $0x108] ss:$16 sps:$4 sm:$0xff]  }
  0x19   :  { %1055 = vmatpush3.bf16.msra.mxu1 %v1137_v23  ;;  %986 = vmatprep.subr.bf16.mxu0 %v1138_v24 }
  0x1a   :  { %1056 = vmatprep.subr.bf16.mxu1 %v1139_v25 }
  0x1c   :  { %987 = vmatpush3.bf16.msra.mxu0 %v1140_v26 }
  0x1d   :  { %1057 = vmatpush3.bf16.msra.mxu1 %v1141_v27  ;;  %988 = vmatprep.subr.bf16.mxu0 %v1142_v28 }
  0x1e   :  { %1058 = vmatprep.subr.bf16.mxu1 %v1143_v29 }
  0x20   :  { %989 = vmatpush3.bf16.msra.mxu0 %v1144_v30 }
  0x21   :  { %1059 = vmatpush3.bf16.msra.mxu1 %v1145_v31 }
  0x23   :  { %527 = vmatmul.mubr.bf16.vlgmr.msra.gmra.mrb[0].mxu0 %v1146_v32 }
  0x24   :  { %632 = vmatmul.mubr.bf16.vlgmr.msra.gmra.mrb[0].mxu1 %v1149_v34  ;;  %534 = vmatprep.mubr.bf16.mxu0 %v1152_v36 }
  0x25   :  { %639 = vmatprep.mubr.bf16.mxu1 %v1154_v37 }
  0x2b   :  { %535 = vmatmul.mubr.bf16.gmra.mrb[4].mxu0 %v1156_v38 }
  0x2c   :  { %640 = vmatmul.mubr.bf16.gmra.mrb[4].mxu1 %v1157_v39  ;;  %542 = vmatprep.mubr.bf16.mxu0 %v1158_v40 }
  0x2d   :  { %647 = vmatprep.mubr.bf16.mxu1 %v1160_v41 }
  0x33   :  { %543 = vmatmul.mubr.bf16.gmra.mrb[8].mxu0 %v1162_v42 }
  0x34   :  { %648 = vmatmul.mubr.bf16.gmra.mrb[8].mxu1 %v1163_v43  ;;  %550 = vmatprep.mubr.bf16.mxu0 %v1164_v44 }
  0x35   :  { %655 = vmatprep.mubr.bf16.mxu1 %v1166_v45 }
  0x3b   :  { %551 = vmatmul.mubr.bf16.gmra.mrb[12].mxu0 %v1168_v46 }
  0x3c   :  { %656 = vmatmul.mubr.bf16.gmra.mrb[12].mxu1 %v1169_v47  ;;  %558 = vmatprep.mubr.bf16.mxu0 %v1170_v48 }
  0x3d   :  { %663 = vmatprep.mubr.bf16.mxu1 %v1172_v49 }
  0x43   :  { %559 = vmatmul.mubr.bf16.gmra.mrb[16].mxu0 %v1174_v50 }
  0x44   :  { %664 = vmatmul.mubr.bf16.gmra.mrb[16].mxu1 %v1175_v51  ;;  %566 = vmatprep.mubr.bf16.mxu0 %v1176_v52 }
  0x45   :  { %671 = vmatprep.mubr.bf16.mxu1 %v1178_v53 }
  0x4b   :  { %567 = vmatmul.mubr.bf16.gmra.mrb[20].mxu0 %v1180_v54 }
  0x4c   :  { %672 = vmatmul.mubr.bf16.gmra.mrb[20].mxu1 %v1181_v55  ;;  %574 = vmatprep.mubr.bf16.mxu0 %v1182_v56 }
  0x4d   :  { %679 = vmatprep.mubr.bf16.mxu1 %v1184_v57 }
  0x53   :  { %575 = vmatmul.mubr.bf16.gmra.mrb[24].mxu0 %v1186_v58 }
  0x54   :  { %680 = vmatmul.mubr.bf16.gmra.mrb[24].mxu1 %v1187_v59  ;;  %582 = vmatprep.mubr.bf16.mxu0 %v1188_v60 }
  0x55   :  { %687 = vmatprep.mubr.bf16.mxu1 %v1190_v61 }
  0x5b   :  { %583 = vmatmul.mubr.bf16.gmra.mrb[28].mxu0 %v1192_v62 }
  0x5c   :  { %688 = vmatmul.mubr.bf16.gmra.mrb[28].mxu1 %v1193_v63  ;;  %590 = vmatprep.mubr.bf16.mxu0 %v1194_v0 }
  0x5d   :  { %695 = vmatprep.mubr.bf16.mxu1 %v1196_v1 }
  0x63   :  { %591 = vmatmul.mubr.bf16.gmra.mrb[32].mxu0 %v1198_v2 }
  0x64   :  { %696 = vmatmul.mubr.bf16.gmra.mrb[32].mxu1 %v1199_v3 }
  0xf6   :  { %v990_v4 = vpop.f32.mrb[0].mxu0 }
  0xf7   :  { %v1060_v5 = vpop.f32.mrb[0].mxu1  ;;  %v991_v7 = vpop.f32.mrb[1].mxu0 }
  0xf8   :  { %v992_v8 = vadd.f32 %v991_v7, %v990_v4  ;;  %v1061_v9 = vpop.f32.mrb[1].mxu1  ;;  %v993_v10 = vpop.f32.mrb[2].mxu0 }
  0xf9   :  { %v1062_v11 = vadd.f32 %v1061_v9, %v1060_v5  ;;  %v1063_v12 = vpop.f32.mrb[2].mxu1  ;;  %v994_v13 = vpop.f32.mrb[3].mxu0 }
  0xfa   :  { %v529_v14 = vadd.f32 %v992_v8, %v1427_v6  ;;  %v995_v15 = vadd.f32 %v994_v13, %v993_v10  ;;  %v1064_v16 = vpop.f32.mrb[3].mxu1 }
  0xfb   :  { %v1065_v17 = vadd.f32 %v1064_v16, %v1063_v12 }
  0xfc   :  { %v634_v18 = vadd.f32 %v1062_v11, %v529_v14  ;;  %v532_v19 = vadd.f32 %v995_v15, %v1427_v6 }
  0xfe   :  { %v637_v20 = vadd.f32 %v1065_v17, %v532_v19  ;;  %v996_v21 = vpop.f32.mrb[4].mxu0  ;;  %v704_v24 = vmax.f32 %v634_v18, 0.0 }
  0xff   :  { %v1066_v22 = vpop.f32.mrb[4].mxu1  ;;  %v997_v23 = vpop.f32.mrb[5].mxu0 }
 0x100   :  { %v705_v25 = vmax.f32 %v637_v20, 0.0  ;;  %v998_v26 = vadd.f32 %v997_v23, %v996_v21  ;;  %v1067_v27 = vpop.f32.mrb[5].mxu1  ;;  %v999_v28 = vpop.f32.mrb[6].mxu0 }
 0x101   :  { %v1068_v29 = vadd.f32 %v1067_v27, %v1066_v22  ;;  %v1069_v30 = vpop.f32.mrb[6].mxu1  ;;  %v1000_v31 = vpop.f32.mrb[7].mxu0 }
 0x102   :  { %v924_v32 = vpack.c.bf16 %v705_v25, %v704_v24  ;;  %v537_v33 = vadd.f32 %v998_v26, %v1427_v6  ;;  %v1001_v34 = vadd.f32 %v1000_v31, %v999_v28  ;;  %v1070_v35 = vpop.f32.mrb[7].mxu1 }
 0x103   :  { %v1071_v36 = vadd.f32 %v1070_v35, %v1069_v30 }
 0x104   :  { %925 = vst [vmem:[%s1477_s3] sm:$0xff] %v924_v32   ;;  %v642_v37 = vadd.f32 %v1068_v29, %v537_v33  ;;  %v540_v38 = vadd.f32 %v1001_v34, %v1427_v6 }
 0x106   :  { %v645_v39 = vadd.f32 %v1071_v36, %v540_v38  ;;  %v1002_v40 = vpop.f32.mrb[8].mxu0  ;;  %v706_v43 = vmax.f32 %v642_v37, 0.0 }
 0x107   :  { %v1072_v41 = vpop.f32.mrb[8].mxu1  ;;  %v1003_v42 = vpop.f32.mrb[9].mxu0 }
 0x108   :  { %v707_v44 = vmax.f32 %v645_v39, 0.0  ;;  %v1004_v45 = vadd.f32 %v1003_v42, %v1002_v40  ;;  %v1073_v46 = vpop.f32.mrb[9].mxu1  ;;  %v1005_v47 = vpop.f32.mrb[10].mxu0 }
 0x109   :  { %v1074_v48 = vadd.f32 %v1073_v46, %v1072_v41  ;;  %v1075_v49 = vpop.f32.mrb[10].mxu1  ;;  %v1006_v50 = vpop.f32.mrb[11].mxu0 }
 0x10a   :  { %v929_v51 = vpack.c.bf16 %v707_v44, %v706_v43  ;;  %v545_v52 = vadd.f32 %v1004_v45, %v1427_v6  ;;  %v1007_v53 = vadd.f32 %v1006_v50, %v1005_v47  ;;  %v1076_v54 = vpop.f32.mrb[11].mxu1 }
 0x10b   :  { %v1077_v55 = vadd.f32 %v1076_v54, %v1075_v49 }
 0x10c   :  { %966 = vst [vmem:[%s1477_s3 + $0x8] sm:$0xff] %v929_v51   ;;  %v650_v56 = vadd.f32 %v1074_v48, %v545_v52  ;;  %v548_v57 = vadd.f32 %v1007_v53, %v1427_v6 }
 0x10e   :  { %v653_v58 = vadd.f32 %v1077_v55, %v548_v57  ;;  %v1008_v59 = vpop.f32.mrb[12].mxu0  ;;  %v708_v62 = vmax.f32 %v650_v56, 0.0 }
 0x10f   :  { %v1078_v60 = vpop.f32.mrb[12].mxu1  ;;  %v1009_v61 = vpop.f32.mrb[13].mxu0 }
 0x110   :  { %v709_v63 = vmax.f32 %v653_v58, 0.0  ;;  %v1010_v0 = vadd.f32 %v1009_v61, %v1008_v59  ;;  %v1079_v1 = vpop.f32.mrb[13].mxu1  ;;  %v1011_v2 = vpop.f32.mrb[14].mxu0 }
 0x111   :  { %v1080_v3 = vadd.f32 %v1079_v1, %v1078_v60  ;;  %v1081_v4 = vpop.f32.mrb[14].mxu1  ;;  %v1012_v5 = vpop.f32.mrb[15].mxu0 }
 0x112   :  { %v934_v7 = vpack.c.bf16 %v709_v63, %v708_v62  ;;  %v553_v8 = vadd.f32 %v1010_v0, %v1427_v6  ;;  %v1013_v9 = vadd.f32 %v1012_v5, %v1011_v2  ;;  %v1082_v10 = vpop.f32.mrb[15].mxu1 }
 0x113   :  { %v1083_v11 = vadd.f32 %v1082_v10, %v1081_v4 }
 0x114   :  { %967 = vst [vmem:[%s1477_s3 + $0x10] sm:$0xff] %v934_v7   ;;  %v658_v12 = vadd.f32 %v1080_v3, %v553_v8  ;;  %v556_v13 = vadd.f32 %v1013_v9, %v1427_v6 }
 0x116   :  { %v661_v14 = vadd.f32 %v1083_v11, %v556_v13  ;;  %v1014_v15 = vpop.f32.mrb[16].mxu0  ;;  %v710_v18 = vmax.f32 %v658_v12, 0.0 }
 0x117   :  { %v1084_v16 = vpop.f32.mrb[16].mxu1  ;;  %v1015_v17 = vpop.f32.mrb[17].mxu0 }
 0x118   :  { %v711_v19 = vmax.f32 %v661_v14, 0.0  ;;  %v1016_v20 = vadd.f32 %v1015_v17, %v1014_v15  ;;  %v1085_v21 = vpop.f32.mrb[17].mxu1  ;;  %v1017_v22 = vpop.f32.mrb[18].mxu0 }
 0x119   :  { %v1086_v23 = vadd.f32 %v1085_v21, %v1084_v16  ;;  %v1087_v24 = vpop.f32.mrb[18].mxu1  ;;  %v1018_v25 = vpop.f32.mrb[19].mxu0 }
 0x11a   :  { %v939_v26 = vpack.c.bf16 %v711_v19, %v710_v18  ;;  %v561_v27 = vadd.f32 %v1016_v20, %v1427_v6  ;;  %v1019_v28 = vadd.f32 %v1018_v25, %v1017_v22  ;;  %v1088_v29 = vpop.f32.mrb[19].mxu1 }
 0x11b   :  { %v1089_v30 = vadd.f32 %v1088_v29, %v1087_v24 }
 0x11c   :  { %968 = vst [vmem:[%s1477_s3 + $0x18] sm:$0xff] %v939_v26   ;;  %v666_v31 = vadd.f32 %v1086_v23, %v561_v27  ;;  %v564_v32 = vadd.f32 %v1019_v28, %v1427_v6 }
 0x11e   :  { %v669_v33 = vadd.f32 %v1089_v30, %v564_v32  ;;  %v1020_v34 = vpop.f32.mrb[20].mxu0  ;;  %v712_v37 = vmax.f32 %v666_v31, 0.0 }
 0x11f   :  { %v1090_v35 = vpop.f32.mrb[20].mxu1  ;;  %v1021_v36 = vpop.f32.mrb[21].mxu0 }
 0x120   :  { %v713_v38 = vmax.f32 %v669_v33, 0.0  ;;  %v1022_v39 = vadd.f32 %v1021_v36, %v1020_v34  ;;  %v1091_v40 = vpop.f32.mrb[21].mxu1  ;;  %v1023_v41 = vpop.f32.mrb[22].mxu0 }
 0x121   :  { %v1092_v42 = vadd.f32 %v1091_v40, %v1090_v35  ;;  %v1093_v43 = vpop.f32.mrb[22].mxu1  ;;  %v1024_v44 = vpop.f32.mrb[23].mxu0 }
 0x122   :  { %v944_v45 = vpack.c.bf16 %v713_v38, %v712_v37  ;;  %v569_v46 = vadd.f32 %v1022_v39, %v1427_v6  ;;  %v1025_v47 = vadd.f32 %v1024_v44, %v1023_v41  ;;  %v1094_v48 = vpop.f32.mrb[23].mxu1 }
 0x123   :  { %v1095_v49 = vadd.f32 %v1094_v48, %v1093_v43 }
 0x124   :  { %969 = vst [vmem:[%s1477_s3 + $0x20] sm:$0xff] %v944_v45   ;;  %v674_v50 = vadd.f32 %v1092_v42, %v569_v46  ;;  %v572_v51 = vadd.f32 %v1025_v47, %v1427_v6 }
 0x126   :  { %v677_v52 = vadd.f32 %v1095_v49, %v572_v51  ;;  %v1026_v53 = vpop.f32.mrb[24].mxu0  ;;  %v714_v56 = vmax.f32 %v674_v50, 0.0 }
 0x127   :  { %v1096_v54 = vpop.f32.mrb[24].mxu1  ;;  %v1027_v55 = vpop.f32.mrb[25].mxu0 }
 0x128   :  { %v715_v57 = vmax.f32 %v677_v52, 0.0  ;;  %v1028_v58 = vadd.f32 %v1027_v55, %v1026_v53  ;;  %v1097_v59 = vpop.f32.mrb[25].mxu1  ;;  %v1029_v60 = vpop.f32.mrb[26].mxu0 }
 0x129   :  { %v1098_v61 = vadd.f32 %v1097_v59, %v1096_v54  ;;  %v1099_v62 = vpop.f32.mrb[26].mxu1  ;;  %v1030_v63 = vpop.f32.mrb[27].mxu0 }
 0x12a   :  { %v949_v0 = vpack.c.bf16 %v715_v57, %v714_v56  ;;  %v577_v1 = vadd.f32 %v1028_v58, %v1427_v6  ;;  %v1031_v2 = vadd.f32 %v1030_v63, %v1029_v60  ;;  %v1100_v3 = vpop.f32.mrb[27].mxu1 }
 0x12b   :  { %v1101_v4 = vadd.f32 %v1100_v3, %v1099_v62 }
 0x12c   :  { %970 = vst [vmem:[%s1477_s3 + $0x28] sm:$0xff] %v949_v0   ;;  %v682_v5 = vadd.f32 %v1098_v61, %v577_v1  ;;  %v580_v7 = vadd.f32 %v1031_v2, %v1427_v6 }
 0x12e   :  { %v685_v8 = vadd.f32 %v1101_v4, %v580_v7  ;;  %v1032_v9 = vpop.f32.mrb[28].mxu0  ;;  %v716_v12 = vmax.f32 %v682_v5, 0.0 }
 0x12f   :  { %v1102_v10 = vpop.f32.mrb[28].mxu1  ;;  %v1033_v11 = vpop.f32.mrb[29].mxu0 }
 0x130   :  { %v717_v13 = vmax.f32 %v685_v8, 0.0  ;;  %v1034_v14 = vadd.f32 %v1033_v11, %v1032_v9  ;;  %v1103_v15 = vpop.f32.mrb[29].mxu1  ;;  %v1035_v16 = vpop.f32.mrb[30].mxu0 }
 0x131   :  { %v1104_v17 = vadd.f32 %v1103_v15, %v1102_v10  ;;  %v1105_v18 = vpop.f32.mrb[30].mxu1  ;;  %v1036_v19 = vpop.f32.mrb[31].mxu0 }
 0x132   :  { %v954_v20 = vpack.c.bf16 %v717_v13, %v716_v12  ;;  %v585_v21 = vadd.f32 %v1034_v14, %v1427_v6  ;;  %v1037_v22 = vadd.f32 %v1036_v19, %v1035_v16  ;;  %v1106_v23 = vpop.f32.mrb[31].mxu1 }
 0x133   :  { %v1107_v24 = vadd.f32 %v1106_v23, %v1105_v18 }
 0x134   :  { %971 = vst [vmem:[%s1477_s3 + $0x30] sm:$0xff] %v954_v20   ;;  %v690_v25 = vadd.f32 %v1104_v17, %v585_v21  ;;  %v588_v26 = vadd.f32 %v1037_v22, %v1427_v6 }
 0x136   :  { %v693_v27 = vadd.f32 %v1107_v24, %v588_v26  ;;  %v1038_v28 = vpop.f32.mrb[32].mxu0  ;;  %v718_v31 = vmax.f32 %v690_v25, 0.0 }
 0x137   :  { %v1108_v29 = vpop.f32.mrb[32].mxu1  ;;  %v1039_v30 = vpop.f32.mrb[33].mxu0 }
 0x138   :  { %v719_v32 = vmax.f32 %v693_v27, 0.0  ;;  %v1040_v33 = vadd.f32 %v1039_v30, %v1038_v28  ;;  %v1109_v34 = vpop.f32.mrb[33].mxu1  ;;  %v1041_v35 = vpop.f32.mrb[34].mxu0 }
 0x139   :  { %v1110_v36 = vadd.f32 %v1109_v34, %v1108_v29  ;;  %v1111_v37 = vpop.f32.mrb[34].mxu1  ;;  %v1042_v38 = vpop.f32.mrb[35].mxu0 }
 0x13a   :  { %v959_v39 = vpack.c.bf16 %v719_v32, %v718_v31  ;;  %v593_v40 = vadd.f32 %v1040_v33, %v1427_v6  ;;  %v1043_v41 = vadd.f32 %v1042_v38, %v1041_v35  ;;  %v1112_v42 = vpop.f32.mrb[35].mxu1 }
 0x13b   :  { %v1113_v43 = vadd.f32 %v1112_v42, %v1111_v37 }
 0x13c   :  { %972 = vst [vmem:[%s1477_s3 + $0x38] sm:$0xff] %v959_v39   ;;  %v698_v44 = vadd.f32 %v1110_v36, %v593_v40  ;;  %v596_v45 = vadd.f32 %v1043_v41, %v1427_v6 }
 0x13e   :  { %v701_v46 = vadd.f32 %v1113_v43, %v596_v45  ;;  %v720_v47 = vmax.f32 %v698_v44, 0.0 }
 0x140   :  { %v721_v48 = vmax.f32 %v701_v46, 0.0 }
 0x142   :  { %v964_v49 = vpack.c.bf16 %v721_v48, %v720_v47 }
 0x144   :  { %973 = vst [vmem:[%s1477_s3 + $0x40] sm:$0xff] %v964_v49  }

// kernel: _lambda_.6
= control target key start
LH: loop header
LB: loop body
LE: loop exit
PB: predicated region body
PF: predicated region fallthrough
CT: control target
= control target key end

     0   :  { %vm434_vm0 = vcmask 523264   ;;  %s1173_s1 = inlined_call_operand.vmem [shape: bf16[576,128], index: 1, kind: input, shape index: {}]   ;;  %s1174_s0 = inlined_call_operand.vmem [shape: bf16[64,576], index: 0, kind: input, shape index: {}]   ;;  %s1175_s2 = inlined_call_operand.vmem [shape: f32[1,128], index: 2, kind: input, shape index: {}]   ;;  %s1176_s3 = inlined_call_operand.vmem [shape: bf16[64,128], index: 3, kind: output, shape index: {}]  }
   0x1   :  { %v906_v0 = vld [vmem:[%s1173_s1 + $0x40] sm:$0xff]   ;;  %v910_v4 = vld [vmem:[%s1173_s1 + $0x48] sm:$0xff]   ;;  %v914_v8 = vld [vmem:[%s1173_s1 + $0x50] sm:$0xff]  }
   0x2   :  { %v907_v1 = vld [vmem:[%s1173_s1 + $0xc0] sm:$0xff]   ;;  %794 = vmatprep.subr.bf16.mxu0 %v906_v0  ;;  %v911_v5 = vld [vmem:[%s1173_s1 + $0xc8] sm:$0xff]   ;;  %v915_v9 = vld [vmem:[%s1173_s1 + $0xd0] sm:$0xff]  }
   0x3   :  { %v908_v2 = vld [vmem:[%s1173_s1] sm:$0xff]   ;;  %834 = vmatprep.subr.bf16.mxu1 %v907_v1  ;;  %v912_v6 = vld [vmem:[%s1173_s1 + $0x8] sm:$0xff]   ;;  %v916_v10 = vld [vmem:[%s1173_s1 + $0x10] sm:$0xff]  }
   0x4   :  { %v909_v3 = vld [vmem:[%s1173_s1 + $0x80] sm:$0xff]   ;;  %795 = vmatpush3.bf16.msra.mxu0 %v908_v2  ;;  %v913_v7 = vld [vmem:[%s1173_s1 + $0x88] sm:$0xff]   ;;  %v917_v11 = vld [vmem:[%s1173_s1 + $0x90] sm:$0xff]  }
   0x5   :  { %835 = vmatpush3.bf16.msra.mxu1 %v909_v3  ;;  %796 = vmatprep.subr.bf16.mxu0 %v910_v4  ;;  %v918_v12 = vld [vmem:[%s1173_s1 + $0x58] sm:$0xff]   ;;  %v922_v16 = vld [vmem:[%s1173_s1 + $0x60] sm:$0xff]   ;;  %v926_v20 = vld [vmem:[%s1173_s1 + $0x68] sm:$0xff]  }
   0x6   :  { %836 = vmatprep.subr.bf16.mxu1 %v911_v5  ;;  %v919_v13 = vld [vmem:[%s1173_s1 + $0xd8] sm:$0xff]   ;;  %v923_v17 = vld [vmem:[%s1173_s1 + $0xe0] sm:$0xff]   ;;  %v927_v21 = vld [vmem:[%s1173_s1 + $0xe8] sm:$0xff]  }
   0x7   :  { %v920_v14 = vld [vmem:[%s1173_s1 + $0x18] sm:$0xff]   ;;  %v924_v18 = vld [vmem:[%s1173_s1 + $0x20] sm:$0xff]   ;;  %v928_v22 = vld [vmem:[%s1173_s1 + $0x28] sm:$0xff]  }
   0x8   :  { %797 = vmatpush3.bf16.msra.mxu0 %v912_v6  ;;  %v921_v15 = vld [vmem:[%s1173_s1 + $0x98] sm:$0xff]   ;;  %v925_v19 = vld [vmem:[%s1173_s1 + $0xa0] sm:$0xff]   ;;  %v929_v23 = vld [vmem:[%s1173_s1 + $0xa8] sm:$0xff]  }
   0x9   :  { %837 = vmatpush3.bf16.msra.mxu1 %v913_v7  ;;  %798 = vmatprep.subr.bf16.mxu0 %v914_v8  ;;  %v930_v24 = vld [vmem:[%s1173_s1 + $0x70] sm:$0xff]   ;;  %v934_v28 = vld [vmem:[%s1173_s1 + $0x78] sm:$0xff]   ;;  %v943_v35 = vld [vmem:[%s1174_s0 + $0xc] ss:$20 sps:$4 sm:$0xff]  }
   0xa   :  { %838 = vmatprep.subr.bf16.mxu1 %v915_v9  ;;  %v931_v25 = vld [vmem:[%s1173_s1 + $0xf0] sm:$0xff]   ;;  %v935_v29 = vld [vmem:[%s1173_s1 + $0xf8] sm:$0xff]   ;;  %v944_v36 = vld [vmem:[%s1173_s1 + $0x100] sm:$0xff]   ;;  %544 = vmatprep.mubr.bf16.mxu1 %v943_v35 }
   0xb   :  { %v932_v26 = vld [vmem:[%s1173_s1 + $0x30] sm:$0xff]   ;;  %v936_v30 = vld [vmem:[%s1173_s1 + $0x38] sm:$0xff]   ;;  %v945_v37 = vld [vmem:[%s1174_s0 + $0x2c] ss:$20 sps:$4 sm:$0xff]  }
   0xc   :  { %799 = vmatpush3.bf16.msra.mxu0 %v916_v10  ;;  %v933_v27 = vld [vmem:[%s1173_s1 + $0xb0] sm:$0xff]   ;;  %v937_v31 = vld [vmem:[%s1173_s1 + $0xb8] sm:$0xff]   ;;  %v951_v39 = vld [vmem:[%s1173_s1 + $0x108] sm:$0xff]  }
   0xd   :  { %839 = vmatpush3.bf16.msra.mxu1 %v917_v11  ;;  %800 = vmatprep.subr.bf16.mxu0 %v918_v12  ;;  %v938_v32 = vld [vmem:[%s1174_s0] ss:$20 sps:$4 sm:$0xff]   ;;  %v940_v33 = vld [vmem:[%s1174_s0 + $0x4] ss:$20 sps:$4 sm:$0xff]   ;;  %v941_v34 = vld [vmem:[%s1174_s0 + $0x8] ss:$20 sps:$4 sm:$0xff]  }
   0xe   :  { %840 = vmatprep.subr.bf16.mxu1 %v919_v13  ;;  %479 = vmatprep.mubr.bf16.mxu0 %v940_v33  ;;  %v947_v38 = vld [vmem:[%s1174_s0 + $0x34] ss:$20 sps:$4 sm:$0xff]   ;;  %v950_v41 = vld [vmem:[%s1174_s0 + $0x30] ss:$20 sps:$4 sm:$0xff]   ;;  %v965_v45 = vld [vmem:[%s1173_s1 + $0x118] sm:$0xff]  }
   0xf   :  { %v949_v40 = vld [vmem:[%s1174_s0 + $0x28] ss:$20 sps:$4 sm:$0xff]   ;;  %v958_v44 = vld [vmem:[%s1173_s1 + $0x110] sm:$0xff]   ;;  %v957_v47 = vld [vmem:[%s1174_s0 + $0x58] ss:$20 sps:$4 sm:$0xff]  }
  0x10   :  { %801 = vmatpush3.bf16.msra.mxu0 %v920_v14  ;;  %v952_v42 = vld [vmem:[%s1174_s0 + $0x54] ss:$20 sps:$4 sm:$0xff]   ;;  %v954_v43 = vld [vmem:[%s1174_s0 + $0x5c] ss:$20 sps:$4 sm:$0xff]   ;;  %v961_v49 = vld [vmem:[%s1174_s0 + $0x84] ss:$20 sps:$4 sm:$0xff]  }
  0x11   :  { %841 = vmatpush3.bf16.msra.mxu1 %v921_v15  ;;  %802 = vmatprep.subr.bf16.mxu0 %v922_v16  ;;  %v956_v46 = vld [vmem:[%s1174_s0 + $0x50] ss:$20 sps:$4 sm:$0xff]   ;;  %v963_v50 = vld [vmem:[%s1174_s0 + $0x78] ss:$20 sps:$4 sm:$0xff]   ;;  %v964_v51 = vld [vmem:[%s1174_s0 + $0x80] ss:$20 sps:$4 sm:$0xff]  }
  0x12   :  { %842 = vmatprep.subr.bf16.mxu1 %v923_v17  ;;  %v959_v48 = vld [vmem:[%s1174_s0 + $0x7c] ss:$20 sps:$4 sm:$0xff]   ;;  %v967_v53 = vld [vmem:[%s1174_s0 + $0x60] ss:$20 sps:$4 sm:$0xff]   ;;  %v968_v54 = vld [vmem:[%s1174_s0 + $0x38] ss:$20 sps:$4 sm:$0xff]  }
  0x13   :  { %v966_v52 = vld [vmem:[%s1174_s0 + $0x10] ss:$20 sps:$4 sm:$0xff]   ;;  %v969_v55 = vld [vmem:[%s1174_s0 + $0x88] ss:$20 sps:$4 sm:$0xff]   ;;  %v694_v58 = vld [vmem:[%s1175_s2] ss:$0 sm:$0xff] }
  0x14   :  { %803 = vmatpush3.bf16.msra.mxu0 %v924_v18 }
  0x15   :  { %843 = vmatpush3.bf16.msra.mxu1 %v925_v19  ;;  %804 = vmatprep.subr.bf16.mxu0 %v926_v20 }
  0x16   :  { %844 = vmatprep.subr.bf16.mxu1 %v927_v21 }
  0x18   :  { %805 = vmatpush3.bf16.msra.mxu0 %v928_v22 }
  0x19   :  { %845 = vmatpush3.bf16.msra.mxu1 %v929_v23  ;;  %806 = vmatprep.subr.bf16.mxu0 %v930_v24 }
  0x1a   :  { %846 = vmatprep.subr.bf16.mxu1 %v931_v25 }
  0x1c   :  { %807 = vmatpush3.bf16.msra.mxu0 %v932_v26 }
  0x1d   :  { %847 = vmatpush3.bf16.msra.mxu1 %v933_v27  ;;  %808 = vmatprep.subr.bf16.mxu0 %v934_v28 }
  0x1e   :  { %848 = vmatprep.subr.bf16.mxu1 %v935_v29 }
  0x20   :  { %809 = vmatpush3.bf16.msra.mxu0 %v936_v30 }
  0x21   :  { %849 = vmatpush3.bf16.msra.mxu1 %v937_v31  ;;  %882 = vmatprep.subr.bf16.mxu0 %v944_v36 }
  0x22   :  { %898 = vmatprep.subr.bf16.mxu1 %v944_v36 }
  0x23   :  { %480 = vmatmul.mubr.bf16.vlgmr.msra.gmra.mrb[0].mxu0 %v938_v32 }
  0x24   :  { %545 = vmatmul.mubr.bf16.vlgmr.msra.gmra.mrb[0].mxu1 %v941_v34  ;;  %883 = vmatpush3.bf16.msra.mxu0 %v944_v36 }
  0x25   :  { %902 = vmatpush3.bf16.msra.mxu1 %v944_v36  ;;  %487 = vmatprep.mubr.bf16.mxu0 %v945_v37 }
  0x26   :  { %552 = vmatprep.mubr.bf16.mxu1 %v947_v38  ;;  %884 = vmatprep.subr.bf16.mxu0 %v951_v39 }
  0x27   :  { %899 = vmatprep.subr.bf16.mxu1 %v951_v39 }
  0x28   :  { %885 = vmatpush3.bf16.msra.mxu0 %v951_v39 }
  0x29   :  { %903 = vmatpush3.bf16.msra.mxu1 %v951_v39  ;;  %886 = vmatprep.subr.bf16.mxu0 %v958_v44 }
  0x2a   :  { %900 = vmatprep.subr.bf16.mxu1 %v958_v44 }
  0x2b   :  { %488 = vmatmul.mubr.bf16.gmra.mrb[4].mxu0 %v949_v40 }
  0x2c   :  { %553 = vmatmul.mubr.bf16.gmra.mrb[4].mxu1 %v950_v41  ;;  %495 = vmatprep.mubr.bf16.mxu0 %v952_v42 }
  0x2d   :  { %560 = vmatprep.mubr.bf16.mxu1 %v954_v43  ;;  %887 = vmatpush3.bf16.msra.mxu0 %v958_v44 }
  0x2e   :  { %904 = vmatpush3.bf16.msra.mxu1 %v958_v44  ;;  %888 = vmatprep.subr.bf16.mxu0 %v965_v45 }
  0x2f   :  { %901 = vmatprep.subr.bf16.mxu1 %v965_v45 }
  0x31   :  { %889 = vmatpush3.bf16.msra.mxu0 %v965_v45 }
  0x32   :  { %905 = vmatpush3.bf16.msra.mxu1 %v965_v45 }
  0x33   :  { %496 = vmatmul.mubr.bf16.gmra.mrb[8].mxu0 %v956_v46 }
  0x34   :  { %561 = vmatmul.mubr.bf16.gmra.mrb[8].mxu1 %v957_v47  ;;  %503 = vmatprep.mubr.bf16.mxu0 %v959_v48 }
  0x35   :  { %568 = vmatprep.mubr.bf16.mxu1 %v961_v49 }
  0x3b   :  { %504 = vmatmul.mubr.bf16.gmra.mrb[12].mxu0 %v963_v50 }
  0x3c   :  { %569 = vmatmul.mubr.bf16.gmra.mrb[12].mxu1 %v964_v51  ;;  %890 = vmatprep.mubr.msk.bf16.mxu0 %vm434_vm0, %v966_v52 }
  0x3d   :  { %894 = vmatprep.mubr.msk.bf16.mxu1 %vm434_vm0, %v967_v53 }
  0x43   :  { %891 = vmatmul.mubr.msk.bf16.vlgmr.msra.gmra.mrb[16].mxu0 %vm434_vm0, %v968_v54 }
  0x44   :  { %895 = vmatmul.mubr.msk.bf16.vlgmr.msra.gmra.mrb[16].mxu1 %vm434_vm0, %v969_v55 }
  0xf6   :  { %v810_v56 = vpop.f32.mrb[0].mxu0 }
  0xf7   :  { %v850_v57 = vpop.f32.mrb[0].mxu1  ;;  %v811_v59 = vpop.f32.mrb[1].mxu0 }
  0xf8   :  { %v812_v60 = vadd.f32 %v811_v59, %v810_v56  ;;  %v851_v61 = vpop.f32.mrb[1].mxu1  ;;  %v813_v62 = vpop.f32.mrb[2].mxu0 }
  0xf9   :  { %v852_v63 = vadd.f32 %v851_v61, %v850_v57  ;;  %v853_v0 = vpop.f32.mrb[2].mxu1  ;;  %v814_v1 = vpop.f32.mrb[3].mxu0 }
  0xfa   :  { %v482_v2 = vadd.f32 %v812_v60, %v694_v58  ;;  %v815_v3 = vadd.f32 %v814_v1, %v813_v62  ;;  %v854_v4 = vpop.f32.mrb[3].mxu1 }
  0xfb   :  { %v855_v5 = vadd.f32 %v854_v4, %v853_v0 }
  0xfc   :  { %v485_v6 = vadd.f32 %v815_v3, %v694_v58  ;;  %v547_v7 = vadd.f32 %v852_v63, %v482_v2 }
  0xfe   :  { %v816_v8 = vpop.f32.mrb[4].mxu0  ;;  %v550_v9 = vadd.f32 %v855_v5, %v485_v6 }
  0xff   :  { %v856_v10 = vpop.f32.mrb[4].mxu1  ;;  %v817_v11 = vpop.f32.mrb[5].mxu0 }
 0x100   :  { %v818_v12 = vadd.f32 %v817_v11, %v816_v8  ;;  %v857_v13 = vpop.f32.mrb[5].mxu1  ;;  %v819_v14 = vpop.f32.mrb[6].mxu0 }
 0x101   :  { %v858_v15 = vadd.f32 %v857_v13, %v856_v10  ;;  %v859_v16 = vpop.f32.mrb[6].mxu1  ;;  %v820_v17 = vpop.f32.mrb[7].mxu0 }
 0x102   :  { %v490_v18 = vadd.f32 %v818_v12, %v694_v58  ;;  %v821_v19 = vadd.f32 %v820_v17, %v819_v14  ;;  %v860_v20 = vpop.f32.mrb[7].mxu1 }
 0x103   :  { %v861_v21 = vadd.f32 %v860_v20, %v859_v16 }
 0x104   :  { %v493_v22 = vadd.f32 %v821_v19, %v694_v58  ;;  %v555_v23 = vadd.f32 %v858_v15, %v490_v18 }
 0x106   :  { %v822_v24 = vpop.f32.mrb[8].mxu0  ;;  %v558_v25 = vadd.f32 %v861_v21, %v493_v22 }
 0x107   :  { %v862_v26 = vpop.f32.mrb[8].mxu1  ;;  %v823_v27 = vpop.f32.mrb[9].mxu0 }
 0x108   :  { %v824_v28 = vadd.f32 %v823_v27, %v822_v24  ;;  %v863_v29 = vpop.f32.mrb[9].mxu1  ;;  %v825_v30 = vpop.f32.mrb[10].mxu0 }
 0x109   :  { %v864_v31 = vadd.f32 %v863_v29, %v862_v26  ;;  %v865_v32 = vpop.f32.mrb[10].mxu1  ;;  %v826_v33 = vpop.f32.mrb[11].mxu0 }
 0x10a   :  { %v498_v34 = vadd.f32 %v824_v28, %v694_v58  ;;  %v827_v35 = vadd.f32 %v826_v33, %v825_v30  ;;  %v866_v36 = vpop.f32.mrb[11].mxu1 }
 0x10b   :  { %v867_v37 = vadd.f32 %v866_v36, %v865_v32 }
 0x10c   :  { %v501_v38 = vadd.f32 %v827_v35, %v694_v58  ;;  %v563_v39 = vadd.f32 %v864_v31, %v498_v34 }
 0x10e   :  { %v828_v40 = vpop.f32.mrb[12].mxu0  ;;  %v566_v41 = vadd.f32 %v867_v37, %v501_v38 }
 0x10f   :  { %v868_v42 = vpop.f32.mrb[12].mxu1  ;;  %v829_v43 = vpop.f32.mrb[13].mxu0 }
 0x110   :  { %v830_v44 = vadd.f32 %v829_v43, %v828_v40  ;;  %v869_v45 = vpop.f32.mrb[13].mxu1  ;;  %v831_v46 = vpop.f32.mrb[14].mxu0 }
 0x111   :  { %v870_v47 = vadd.f32 %v869_v45, %v868_v42  ;;  %v871_v48 = vpop.f32.mrb[14].mxu1  ;;  %v832_v49 = vpop.f32.mrb[15].mxu0 }
 0x112   :  { %v506_v50 = vadd.f32 %v830_v44, %v694_v58  ;;  %v833_v51 = vadd.f32 %v832_v49, %v831_v46  ;;  %v872_v52 = vpop.f32.mrb[15].mxu1 }
 0x113   :  { %v873_v53 = vadd.f32 %v872_v52, %v871_v48 }
 0x114   :  { %v509_v54 = vadd.f32 %v833_v51, %v694_v58  ;;  %v571_v55 = vadd.f32 %v870_v47, %v506_v50 }
 0x116   :  { %v892_v56 = vpop.f32.mrb[16].mxu0  ;;  %v574_v57 = vadd.f32 %v873_v53, %v509_v54 }
 0x117   :  { %v620_v59 = vadd.f32 %v892_v56, %v555_v23  ;;  %v896_v60 = vpop.f32.mrb[16].mxu1  ;;  %v611_v61 = vpop.f32.mrb[17].mxu0 }
 0x118   :  { %v636_v62 = vadd.f32 %v896_v60, %v571_v55  ;;  %v612_v63 = vadd.f32 %v611_v61, %v547_v7  ;;  %v627_v0 = vpop.f32.mrb[17].mxu1  ;;  %v893_v1 = vpop.f32.mrb[18].mxu0 }
 0x119   :  { %v628_v2 = vadd.f32 %v627_v0, %v563_v39  ;;  %v623_v3 = vadd.f32 %v893_v1, %v558_v25  ;;  %v897_v4 = vpop.f32.mrb[18].mxu1  ;;  %v614_v5 = vpop.f32.mrb[19].mxu0  ;;  %v644_v11 = vmax.f32 %v620_v59, 0.0 }
 0x11a   :  { %v639_v6 = vadd.f32 %v897_v4, %v574_v57  ;;  %v615_v8 = vadd.f32 %v614_v5, %v550_v9  ;;  %v630_v10 = vpop.f32.mrb[19].mxu1  ;;  %v648_v13 = vmax.f32 %v636_v62, 0.0  ;;  %v642_v14 = vmax.f32 %v612_v63, 0.0 }
 0x11b   :  { %v645_v12 = vmax.f32 %v623_v3, 0.0  ;;  %v631_v58 = vadd.f32 %v630_v10, %v566_v41  ;;  %v646_v17 = vmax.f32 %v628_v2, 0.0 }
 0x11c   :  { %v649_v15 = vmax.f32 %v639_v6, 0.0  ;;  %v643_v16 = vmax.f32 %v615_v8, 0.0 }
 0x11d   :  { %v779_v18 = vpack.c.bf16 %v645_v12, %v644_v11  ;;  %v647_v19 = vmax.f32 %v631_v58, 0.0 }
 0x11e   :  { %v789_v7 = vpack.c.bf16 %v649_v15, %v648_v13  ;;  %v774_v20 = vpack.c.bf16 %v643_v16, %v642_v14 }
 0x11f   :  { %791 = vst [vmem:[%s1176_s3 + $0x8] sm:$0xff] %v779_v18   ;;  %v784_v21 = vpack.c.bf16 %v647_v19, %v646_v17 }
 0x120   :  { %793 = vst [vmem:[%s1176_s3 + $0x18] sm:$0xff] %v789_v7   ;;  %775 = vst [vmem:[%s1176_s3] sm:$0xff] %v774_v20  }
 0x121   :  { %792 = vst [vmem:[%s1176_s3 + $0x10] sm:$0xff] %v784_v21  }

// kernel: _lambda_.7
= control target key start
LH: loop header
LB: loop body
LE: loop exit
PB: predicated region body
PF: predicated region fallthrough
CT: control target
= control target key end

     0   :  { %s2388_s1 = inlined_call_operand.vmem [shape: bf16[2048,128], index: 1, kind: input, shape index: {}]   ;;  %s2389_s0 = inlined_call_operand.vmem [shape: bf16[16,2048], index: 0, kind: input, shape index: {}]   ;;  %s2390_s2 = inlined_call_operand.vmem [shape: f32[1,128], index: 2, kind: input, shape index: {}]   ;;  %s2391_s3 = inlined_call_operand.vmem [shape: f32[16,128], index: 3, kind: output, shape index: {}]  }
   0x1   :  { %v1799_v0 = vld [vmem:[%s2388_s1 + $0x40] sm:$0xff]   ;;  %v1803_v4 = vld [vmem:[%s2388_s1 + $0x48] sm:$0xff]   ;;  %v1807_v8 = vld [vmem:[%s2388_s1 + $0x50] sm:$0xff]  }
   0x2   :  { %v1800_v1 = vld [vmem:[%s2388_s1 + $0xc0] sm:$0xff]   ;;  %1623 = vmatprep.subr.bf16.mxu0 %v1799_v0  ;;  %v1804_v5 = vld [vmem:[%s2388_s1 + $0xc8] sm:$0xff]   ;;  %v1808_v9 = vld [vmem:[%s2388_s1 + $0xd0] sm:$0xff]  }
   0x3   :  { %v1801_v2 = vld [vmem:[%s2388_s1] sm:$0xff]   ;;  %1645 = vmatprep.subr.bf16.mxu1 %v1800_v1  ;;  %v1805_v6 = vld [vmem:[%s2388_s1 + $0x8] sm:$0xff]   ;;  %v1809_v10 = vld [vmem:[%s2388_s1 + $0x10] sm:$0xff]  }
   0x4   :  { %v1802_v3 = vld [vmem:[%s2388_s1 + $0x80] sm:$0xff]   ;;  %1624 = vmatpush3.bf16.msra.mxu0 %v1801_v2  ;;  %v1806_v7 = vld [vmem:[%s2388_s1 + $0x88] sm:$0xff]   ;;  %v1810_v11 = vld [vmem:[%s2388_s1 + $0x90] sm:$0xff]  }
   0x5   :  { %1646 = vmatpush3.bf16.msra.mxu1 %v1802_v3  ;;  %1625 = vmatprep.subr.bf16.mxu0 %v1803_v4  ;;  %v1811_v12 = vld [vmem:[%s2388_s1 + $0x58] sm:$0xff]   ;;  %v1815_v16 = vld [vmem:[%s2388_s1 + $0x60] sm:$0xff]   ;;  %v1819_v20 = vld [vmem:[%s2388_s1 + $0x68] sm:$0xff]  }
   0x6   :  { %1647 = vmatprep.subr.bf16.mxu1 %v1804_v5  ;;  %v1812_v13 = vld [vmem:[%s2388_s1 + $0xd8] sm:$0xff]   ;;  %v1816_v17 = vld [vmem:[%s2388_s1 + $0xe0] sm:$0xff]   ;;  %v1820_v21 = vld [vmem:[%s2388_s1 + $0xe8] sm:$0xff]  }
   0x7   :  { %v1813_v14 = vld [vmem:[%s2388_s1 + $0x18] sm:$0xff]   ;;  %v1817_v18 = vld [vmem:[%s2388_s1 + $0x20] sm:$0xff]   ;;  %v1821_v22 = vld [vmem:[%s2388_s1 + $0x28] sm:$0xff]  }
   0x8   :  { %1626 = vmatpush3.bf16.msra.mxu0 %v1805_v6  ;;  %v1814_v15 = vld [vmem:[%s2388_s1 + $0x98] sm:$0xff]   ;;  %v1818_v19 = vld [vmem:[%s2388_s1 + $0xa0] sm:$0xff]   ;;  %v1822_v23 = vld [vmem:[%s2388_s1 + $0xa8] sm:$0xff]  }
   0x9   :  { %1648 = vmatpush3.bf16.msra.mxu1 %v1806_v7  ;;  %1627 = vmatprep.subr.bf16.mxu0 %v1807_v8  ;;  %v1823_v24 = vld [vmem:[%s2388_s1 + $0x70] sm:$0xff]   ;;  %v1827_v28 = vld [vmem:[%s2388_s1 + $0x78] sm:$0xff]   ;;  %v15_v32 = vld [vmem:[%s2389_s0] sm:$0xff] }
   0xa   :  { %1649 = vmatprep.subr.bf16.mxu1 %v1808_v9  ;;  %v1824_v25 = vld [vmem:[%s2388_s1 + $0xf0] sm:$0xff]   ;;  %v1828_v29 = vld [vmem:[%s2388_s1 + $0xf8] sm:$0xff]   ;;  %v23_v33 = vld [vmem:[%s2389_s0 + $0x40] sm:$0xff] }
   0xb   :  { %v1825_v26 = vld [vmem:[%s2388_s1 + $0x30] sm:$0xff]   ;;  %v1829_v30 = vld [vmem:[%s2388_s1 + $0x38] sm:$0xff]   ;;  %v16_v34 = vld [vmem:[%s2389_s0 + $0x8] sm:$0xff]  ;;  %v1479_v35 = vcombine.low %v15_v32, %v23_v33  ;;  %v1480_v36 = vcombine.high %v15_v32, %v23_v33 }
   0xc   :  { %1628 = vmatpush3.bf16.msra.mxu0 %v1809_v10  ;;  %v1826_v27 = vld [vmem:[%s2388_s1 + $0xb0] sm:$0xff]   ;;  %v1830_v31 = vld [vmem:[%s2388_s1 + $0xb8] sm:$0xff]   ;;  %v24_v37 = vld [vmem:[%s2389_s0 + $0x48] sm:$0xff] }
   0xd   :  { %1650 = vmatpush3.bf16.msra.mxu1 %v1810_v11  ;;  %1629 = vmatprep.subr.bf16.mxu0 %v1811_v12  ;;  %v1481_v38 = vcombine.low %v16_v34, %v24_v37  ;;  %v1482_v39 = vcombine.high %v16_v34, %v24_v37  ;;  %v1831_v40 = vld [vmem:[%s2388_s1 + $0x140] sm:$0xff]   ;;  %v1835_v44 = vld [vmem:[%s2388_s1 + $0x148] sm:$0xff]   ;;  %v1839_v48 = vld [vmem:[%s2388_s1 + $0x150] sm:$0xff]  }
   0xe   :  { %1651 = vmatprep.subr.bf16.mxu1 %v1812_v13  ;;  %1174 = vmatprep.mubr.bf16.mxu0 %v1480_v36  ;;  %v1832_v41 = vld [vmem:[%s2388_s1 + $0x1c0] sm:$0xff]   ;;  %v1836_v45 = vld [vmem:[%s2388_s1 + $0x1c8] sm:$0xff]   ;;  %v1840_v49 = vld [vmem:[%s2388_s1 + $0x1d0] sm:$0xff]  }
   0xf   :  { %1215 = vmatprep.mubr.bf16.mxu1 %v1482_v39  ;;  %v1833_v42 = vld [vmem:[%s2388_s1 + $0x100] sm:$0xff]   ;;  %v1837_v46 = vld [vmem:[%s2388_s1 + $0x108] sm:$0xff]   ;;  %v1841_v50 = vld [vmem:[%s2388_s1 + $0x110] sm:$0xff]  }
  0x10   :  { %1630 = vmatpush3.bf16.msra.mxu0 %v1813_v14  ;;  %v1834_v43 = vld [vmem:[%s2388_s1 + $0x180] sm:$0xff]   ;;  %v1838_v47 = vld [vmem:[%s2388_s1 + $0x188] sm:$0xff]   ;;  %v1842_v51 = vld [vmem:[%s2388_s1 + $0x190] sm:$0xff]  }
  0x11   :  { %1652 = vmatpush3.bf16.msra.mxu1 %v1814_v15  ;;  %1631 = vmatprep.subr.bf16.mxu0 %v1815_v16  ;;  %v1843_v52 = vld [vmem:[%s2388_s1 + $0x158] sm:$0xff]   ;;  %v1847_v56 = vld [vmem:[%s2388_s1 + $0x160] sm:$0xff]   ;;  %v1851_v60 = vld [vmem:[%s2388_s1 + $0x168] sm:$0xff]  }
  0x12   :  { %1653 = vmatprep.subr.bf16.mxu1 %v1816_v17  ;;  %v1844_v53 = vld [vmem:[%s2388_s1 + $0x1d8] sm:$0xff]   ;;  %v1848_v57 = vld [vmem:[%s2388_s1 + $0x1e0] sm:$0xff]   ;;  %v1852_v61 = vld [vmem:[%s2388_s1 + $0x1e8] sm:$0xff]  }
  0x13   :  { %v1845_v54 = vld [vmem:[%s2388_s1 + $0x118] sm:$0xff]   ;;  %v1849_v58 = vld [vmem:[%s2388_s1 + $0x120] sm:$0xff]   ;;  %v1853_v62 = vld [vmem:[%s2388_s1 + $0x128] sm:$0xff]  }
  0x14   :  { %1632 = vmatpush3.bf16.msra.mxu0 %v1817_v18  ;;  %v1846_v55 = vld [vmem:[%s2388_s1 + $0x198] sm:$0xff]   ;;  %v1850_v59 = vld [vmem:[%s2388_s1 + $0x1a0] sm:$0xff]   ;;  %v1854_v63 = vld [vmem:[%s2388_s1 + $0x1a8] sm:$0xff]  }
  0x15   :  { %1654 = vmatpush3.bf16.msra.mxu1 %v1818_v19  ;;  %1633 = vmatprep.subr.bf16.mxu0 %v1819_v20  ;;  %v1855_v0 = vld [vmem:[%s2388_s1 + $0x170] sm:$0xff]   ;;  %v1859_v4 = vld [vmem:[%s2388_s1 + $0x178] sm:$0xff]   ;;  %v1863_v16 = vld [vmem:[%s2388_s1 + $0x240] sm:$0xff]  }
  0x16   :  { %1655 = vmatprep.subr.bf16.mxu1 %v1820_v21  ;;  %v1856_v1 = vld [vmem:[%s2388_s1 + $0x1f0] sm:$0xff]   ;;  %v1860_v5 = vld [vmem:[%s2388_s1 + $0x1f8] sm:$0xff]   ;;  %v1864_v17 = vld [vmem:[%s2388_s1 + $0x2c0] sm:$0xff]  }
  0x17   :  { %v1857_v2 = vld [vmem:[%s2388_s1 + $0x130] sm:$0xff]   ;;  %v1861_v6 = vld [vmem:[%s2388_s1 + $0x138] sm:$0xff]   ;;  %v1865_v18 = vld [vmem:[%s2388_s1 + $0x200] sm:$0xff]  }
  0x18   :  { %1634 = vmatpush3.bf16.msra.mxu0 %v1821_v22  ;;  %v1858_v3 = vld [vmem:[%s2388_s1 + $0x1b0] sm:$0xff]   ;;  %v1862_v7 = vld [vmem:[%s2388_s1 + $0x1b8] sm:$0xff]   ;;  %v1866_v19 = vld [vmem:[%s2388_s1 + $0x280] sm:$0xff]  }
  0x19   :  { %1656 = vmatpush3.bf16.msra.mxu1 %v1822_v23  ;;  %1635 = vmatprep.subr.bf16.mxu0 %v1823_v24  ;;  %v17_v8 = vld [vmem:[%s2389_s0 + $0x10] sm:$0xff]  ;;  %v18_v12 = vld [vmem:[%s2389_s0 + $0x18] sm:$0xff]  ;;  %v1867_v20 = vld [vmem:[%s2388_s1 + $0x248] sm:$0xff]  }
  0x1a   :  { %1657 = vmatprep.subr.bf16.mxu1 %v1824_v25  ;;  %v25_v9 = vld [vmem:[%s2389_s0 + $0x50] sm:$0xff]  ;;  %v26_v13 = vld [vmem:[%s2389_s0 + $0x58] sm:$0xff]  ;;  %v1868_v21 = vld [vmem:[%s2388_s1 + $0x2c8] sm:$0xff]  }
  0x1b   :  { %v1483_v10 = vcombine.low %v17_v8, %v25_v9  ;;  %v1484_v11 = vcombine.high %v17_v8, %v25_v9  ;;  %v1485_v14 = vcombine.low %v18_v12, %v26_v13  ;;  %v1486_v15 = vcombine.high %v18_v12, %v26_v13  ;;  %v1869_v22 = vld [vmem:[%s2388_s1 + $0x208] sm:$0xff]   ;;  %v1871_v24 = vld [vmem:[%s2388_s1 + $0x250] sm:$0xff]   ;;  %v1879_v32 = vld [vmem:[%s2388_s1 + $0x260] sm:$0xff]  }
  0x1c   :  { %1636 = vmatpush3.bf16.msra.mxu0 %v1825_v26  ;;  %v1870_v23 = vld [vmem:[%s2388_s1 + $0x288] sm:$0xff]   ;;  %v1872_v25 = vld [vmem:[%s2388_s1 + $0x2d0] sm:$0xff]   ;;  %v1880_v33 = vld [vmem:[%s2388_s1 + $0x2e0] sm:$0xff]  }
  0x1d   :  { %1658 = vmatpush3.bf16.msra.mxu1 %v1826_v27  ;;  %1637 = vmatprep.subr.bf16.mxu0 %v1827_v28  ;;  %v1873_v26 = vld [vmem:[%s2388_s1 + $0x210] sm:$0xff]   ;;  %v1875_v28 = vld [vmem:[%s2388_s1 + $0x258] sm:$0xff]   ;;  %v1881_v34 = vld [vmem:[%s2388_s1 + $0x220] sm:$0xff]  }
  0x1e   :  { %1659 = vmatprep.subr.bf16.mxu1 %v1828_v29  ;;  %v1874_v27 = vld [vmem:[%s2388_s1 + $0x290] sm:$0xff]   ;;  %v1876_v29 = vld [vmem:[%s2388_s1 + $0x2d8] sm:$0xff]   ;;  %v1883_v36 = vld [vmem:[%s2388_s1 + $0x268] sm:$0xff]  }
  0x1f   :  { %v1884_v37 = vld [vmem:[%s2388_s1 + $0x2e8] sm:$0xff]   ;;  %v1911_v8 = vld [vmem:[%s2388_s1 + $0x360] sm:$0xff]  }
  0x20   :  { %1638 = vmatpush3.bf16.msra.mxu0 %v1829_v30  ;;  %v1877_v30 = vld [vmem:[%s2388_s1 + $0x218] sm:$0xff]   ;;  %v1886_v39 = vld [vmem:[%s2388_s1 + $0x2a8] sm:$0xff]   ;;  %v1912_v9 = vld [vmem:[%s2388_s1 + $0x3e0] sm:$0xff]  }
  0x21   :  { %1660 = vmatpush3.bf16.msra.mxu1 %v1830_v31  ;;  %1667 = vmatprep.subr.bf16.mxu0 %v1831_v40  ;;  %v1878_v31 = vld [vmem:[%s2388_s1 + $0x298] sm:$0xff]   ;;  %v1887_v40 = vld [vmem:[%s2388_s1 + $0x270] sm:$0xff]   ;;  %v1915_v12 = vld [vmem:[%s2388_s1 + $0x368] sm:$0xff]  }
  0x22   :  { %1689 = vmatprep.subr.bf16.mxu1 %v1832_v41  ;;  %v1888_v41 = vld [vmem:[%s2388_s1 + $0x2f0] sm:$0xff]   ;;  %v1916_v13 = vld [vmem:[%s2388_s1 + $0x3e8] sm:$0xff]  }
  0x23   :  { %1175 = vmatmul.mubr.bf16.vlgmr.msra.gmra.mrb[0].mxu0 %v1479_v35  ;;  %v1882_v35 = vld [vmem:[%s2388_s1 + $0x2a0] sm:$0xff]  }
  0x24   :  { %1216 = vmatmul.mubr.bf16.vlgmr.msra.gmra.mrb[0].mxu1 %v1481_v38  ;;  %1668 = vmatpush3.bf16.msra.mxu0 %v1833_v42  ;;  %v1885_v38 = vld [vmem:[%s2388_s1 + $0x228] sm:$0xff]   ;;  %v1889_v42 = vld [vmem:[%s2388_s1 + $0x230] sm:$0xff]  }
  0x25   :  { %1690 = vmatpush3.bf16.msra.mxu1 %v1834_v43  ;;  %1669 = vmatprep.subr.bf16.mxu0 %v1835_v44  ;;  %v1890_v43 = vld [vmem:[%s2388_s1 + $0x2b0] sm:$0xff]   ;;  %v1891_v44 = vld [vmem:[%s2388_s1 + $0x278] sm:$0xff]  }
  0x26   :  { %1691 = vmatprep.subr.bf16.mxu1 %v1836_v45  ;;  %1256 = vmatprep.mubr.bf16.mxu0 %v1484_v11  ;;  %v1892_v45 = vld [vmem:[%s2388_s1 + $0x2f8] sm:$0xff]   ;;  %v1914_v11 = vld [vmem:[%s2388_s1 + $0x3a0] sm:$0xff]  }
  0x27   :  { %1297 = vmatprep.mubr.bf16.mxu1 %v1486_v15  ;;  %v1918_v15 = vld [vmem:[%s2388_s1 + $0x3a8] sm:$0xff]  }
  0x28   :  { %1670 = vmatpush3.bf16.msra.mxu0 %v1837_v46  ;;  %v1893_v46 = vld [vmem:[%s2388_s1 + $0x238] sm:$0xff]  }
  0x29   :  { %1692 = vmatpush3.bf16.msra.mxu1 %v1838_v47  ;;  %1671 = vmatprep.subr.bf16.mxu0 %v1839_v48  ;;  %v1894_v47 = vld [vmem:[%s2388_s1 + $0x2b8] sm:$0xff]   ;;  %v19_v48 = vld [vmem:[%s2389_s0 + $0x20] sm:$0xff] }
  0x2a   :  { %1693 = vmatprep.subr.bf16.mxu1 %v1840_v49  ;;  %v27_v49 = vld [vmem:[%s2389_s0 + $0x60] sm:$0xff] }
  0x2c   :  { %1672 = vmatpush3.bf16.msra.mxu0 %v1841_v50  ;;  %v20_v50 = vld [vmem:[%s2389_s0 + $0x28] sm:$0xff] }
  0x2d   :  { %1694 = vmatpush3.bf16.msra.mxu1 %v1842_v51  ;;  %1673 = vmatprep.subr.bf16.mxu0 %v1843_v52  ;;  %v28_v51 = vld [vmem:[%s2389_s0 + $0x68] sm:$0xff]  ;;  %v1487_v52 = vcombine.low %v19_v48, %v27_v49 }
  0x2e   :  { %1695 = vmatprep.subr.bf16.mxu1 %v1844_v53  ;;  %v1488_v53 = vcombine.high %v19_v48, %v27_v49 }
  0x30   :  { %1674 = vmatpush3.bf16.msra.mxu0 %v1845_v54  ;;  %v1489_v54 = vcombine.low %v20_v50, %v28_v51 }
  0x31   :  { %1696 = vmatpush3.bf16.msra.mxu1 %v1846_v55  ;;  %1675 = vmatprep.subr.bf16.mxu0 %v1847_v56  ;;  %v1490_v55 = vcombine.high %v20_v50, %v28_v51  ;;  %v1895_v56 = vld [vmem:[%s2388_s1 + $0x340] sm:$0xff]  }
  0x32   :  { %1697 = vmatprep.subr.bf16.mxu1 %v1848_v57  ;;  %v1896_v57 = vld [vmem:[%s2388_s1 + $0x3c0] sm:$0xff]  }
  0x34   :  { %1676 = vmatpush3.bf16.msra.mxu0 %v1849_v58  ;;  %v1897_v58 = vld [vmem:[%s2388_s1 + $0x300] sm:$0xff]  }
  0x35   :  { %1698 = vmatpush3.bf16.msra.mxu1 %v1850_v59  ;;  %1677 = vmatprep.subr.bf16.mxu0 %v1851_v60  ;;  %v1898_v59 = vld [vmem:[%s2388_s1 + $0x380] sm:$0xff]   ;;  %v1899_v60 = vld [vmem:[%s2388_s1 + $0x348] sm:$0xff]  }
  0x36   :  { %1699 = vmatprep.subr.bf16.mxu1 %v1852_v61  ;;  %v1900_v61 = vld [vmem:[%s2388_s1 + $0x3c8] sm:$0xff]  }
  0x38   :  { %1678 = vmatpush3.bf16.msra.mxu0 %v1853_v62  ;;  %v1901_v62 = vld [vmem:[%s2388_s1 + $0x308] sm:$0xff]  }
  0x39   :  { %1700 = vmatpush3.bf16.msra.mxu1 %v1854_v63  ;;  %1679 = vmatprep.subr.bf16.mxu0 %v1855_v0  ;;  %v1902_v63 = vld [vmem:[%s2388_s1 + $0x388] sm:$0xff]   ;;  %v1903_v0 = vld [vmem:[%s2388_s1 + $0x350] sm:$0xff]  }
  0x3a   :  { %1701 = vmatprep.subr.bf16.mxu1 %v1856_v1  ;;  %v1904_v1 = vld [vmem:[%s2388_s1 + $0x3d0] sm:$0xff]  }
  0x3c   :  { %1680 = vmatpush3.bf16.msra.mxu0 %v1857_v2  ;;  %v1905_v2 = vld [vmem:[%s2388_s1 + $0x310] sm:$0xff]  }
  0x3d   :  { %1702 = vmatpush3.bf16.msra.mxu1 %v1858_v3  ;;  %1681 = vmatprep.subr.bf16.mxu0 %v1859_v4  ;;  %v1906_v3 = vld [vmem:[%s2388_s1 + $0x390] sm:$0xff]   ;;  %v1907_v4 = vld [vmem:[%s2388_s1 + $0x358] sm:$0xff]  }
  0x3e   :  { %1703 = vmatprep.subr.bf16.mxu1 %v1860_v5  ;;  %v1908_v5 = vld [vmem:[%s2388_s1 + $0x3d8] sm:$0xff]  }
  0x40   :  { %1682 = vmatpush3.bf16.msra.mxu0 %v1861_v6  ;;  %v1909_v6 = vld [vmem:[%s2388_s1 + $0x318] sm:$0xff]  }
  0x41   :  { %1704 = vmatpush3.bf16.msra.mxu1 %v1862_v7  ;;  %1711 = vmatprep.subr.bf16.mxu0 %v1863_v16  ;;  %v1910_v7 = vld [vmem:[%s2388_s1 + $0x398] sm:$0xff]   ;;  %v1919_v16 = vld [vmem:[%s2388_s1 + $0x370] sm:$0xff]  }
  0x42   :  { %1733 = vmatprep.subr.bf16.mxu1 %v1864_v17  ;;  %v1920_v17 = vld [vmem:[%s2388_s1 + $0x3f0] sm:$0xff]  }
  0x43   :  { %1257 = vmatmul.mubr.bf16.vlgmr.msra.gmra.mrb[4].mxu0 %v1483_v10  ;;  %v1913_v10 = vld [vmem:[%s2388_s1 + $0x320] sm:$0xff]  }
  0x44   :  { %1298 = vmatmul.mubr.bf16.vlgmr.msra.gmra.mrb[4].mxu1 %v1485_v14  ;;  %1712 = vmatpush3.bf16.msra.mxu0 %v1865_v18  ;;  %v1917_v14 = vld [vmem:[%s2388_s1 + $0x328] sm:$0xff]   ;;  %v1921_v18 = vld [vmem:[%s2388_s1 + $0x330] sm:$0xff]  }
  0x45   :  { %1734 = vmatpush3.bf16.msra.mxu1 %v1866_v19  ;;  %1713 = vmatprep.subr.bf16.mxu0 %v1867_v20  ;;  %v1922_v19 = vld [vmem:[%s2388_s1 + $0x3b0] sm:$0xff]   ;;  %v1923_v20 = vld [vmem:[%s2388_s1 + $0x378] sm:$0xff]  }
  0x46   :  { %1735 = vmatprep.subr.bf16.mxu1 %v1868_v21  ;;  %1338 = vmatprep.mubr.bf16.mxu0 %v1488_v53  ;;  %v1924_v21 = vld [vmem:[%s2388_s1 + $0x3f8] sm:$0xff]  }
  0x47   :  { %1379 = vmatprep.mubr.bf16.mxu1 %v1490_v55 }
  0x48   :  { %1714 = vmatpush3.bf16.msra.mxu0 %v1869_v22  ;;  %v1925_v22 = vld [vmem:[%s2388_s1 + $0x338] sm:$0xff]  }
  0x49   :  { %1736 = vmatpush3.bf16.msra.mxu1 %v1870_v23  ;;  %1715 = vmatprep.subr.bf16.mxu0 %v1871_v24  ;;  %v1926_v23 = vld [vmem:[%s2388_s1 + $0x3b8] sm:$0xff]   ;;  %v21_v24 = vld [vmem:[%s2389_s0 + $0x30] sm:$0xff] }
  0x4a   :  { %1737 = vmatprep.subr.bf16.mxu1 %v1872_v25  ;;  %v29_v25 = vld [vmem:[%s2389_s0 + $0x70] sm:$0xff] }
  0x4c   :  { %1716 = vmatpush3.bf16.msra.mxu0 %v1873_v26  ;;  %v22_v26 = vld [vmem:[%s2389_s0 + $0x38] sm:$0xff] }
  0x4d   :  { %1738 = vmatpush3.bf16.msra.mxu1 %v1874_v27  ;;  %1717 = vmatprep.subr.bf16.mxu0 %v1875_v28  ;;  %v1491_v27 = vcombine.low %v21_v24, %v29_v25  ;;  %v1492_v28 = vcombine.high %v21_v24, %v29_v25 }
  0x4e   :  { %1739 = vmatprep.subr.bf16.mxu1 %v1876_v29  ;;  %v30_v29 = vld [vmem:[%s2389_s0 + $0x78] sm:$0xff] }
  0x50   :  { %1718 = vmatpush3.bf16.msra.mxu0 %v1877_v30  ;;  %v1493_v30 = vcombine.low %v22_v26, %v30_v29 }
  0x51   :  { %1740 = vmatpush3.bf16.msra.mxu1 %v1878_v31  ;;  %1719 = vmatprep.subr.bf16.mxu0 %v1879_v32  ;;  %v1494_v31 = vcombine.high %v22_v26, %v30_v29 }
  0x52   :  { %1741 = vmatprep.subr.bf16.mxu1 %v1880_v33 }
  0x54   :  { %1720 = vmatpush3.bf16.msra.mxu0 %v1881_v34  ;;  %v1478_v34 = vld [vmem:[%s2390_s2] ss:$0 sm:$0xff] }
  0x55   :  { %1742 = vmatpush3.bf16.msra.mxu1 %v1882_v35  ;;  %1721 = vmatprep.subr.bf16.mxu0 %v1883_v36 }
  0x56   :  { %1743 = vmatprep.subr.bf16.mxu1 %v1884_v37 }
  0x58   :  { %1722 = vmatpush3.bf16.msra.mxu0 %v1885_v38 }
  0x59   :  { %1744 = vmatpush3.bf16.msra.mxu1 %v1886_v39  ;;  %1723 = vmatprep.subr.bf16.mxu0 %v1887_v40 }
  0x5a   :  { %1745 = vmatprep.subr.bf16.mxu1 %v1888_v41 }
  0x5c   :  { %1724 = vmatpush3.bf16.msra.mxu0 %v1889_v42 }
  0x5d   :  { %1746 = vmatpush3.bf16.msra.mxu1 %v1890_v43  ;;  %1725 = vmatprep.subr.bf16.mxu0 %v1891_v44 }
  0x5e   :  { %1747 = vmatprep.subr.bf16.mxu1 %v1892_v45 }
  0x60   :  { %1726 = vmatpush3.bf16.msra.mxu0 %v1893_v46 }
  0x61   :  { %1748 = vmatpush3.bf16.msra.mxu1 %v1894_v47  ;;  %1755 = vmatprep.subr.bf16.mxu0 %v1895_v56 }
  0x62   :  { %1777 = vmatprep.subr.bf16.mxu1 %v1896_v57 }
  0x63   :  { %1339 = vmatmul.mubr.bf16.vlgmr.msra.gmra.mrb[8].mxu0 %v1487_v52 }
  0x64   :  { %1380 = vmatmul.mubr.bf16.vlgmr.msra.gmra.mrb[8].mxu1 %v1489_v54  ;;  %1756 = vmatpush3.bf16.msra.mxu0 %v1897_v58 }
  0x65   :  { %1778 = vmatpush3.bf16.msra.mxu1 %v1898_v59  ;;  %1757 = vmatprep.subr.bf16.mxu0 %v1899_v60 }
  0x66   :  { %1779 = vmatprep.subr.bf16.mxu1 %v1900_v61  ;;  %1420 = vmatprep.mubr.bf16.mxu0 %v1492_v28 }
  0x67   :  { %1461 = vmatprep.mubr.bf16.mxu1 %v1494_v31 }
  0x68   :  { %1758 = vmatpush3.bf16.msra.mxu0 %v1901_v62 }
  0x69   :  { %1780 = vmatpush3.bf16.msra.mxu1 %v1902_v63  ;;  %1759 = vmatprep.subr.bf16.mxu0 %v1903_v0 }
  0x6a   :  { %1781 = vmatprep.subr.bf16.mxu1 %v1904_v1 }
  0x6c   :  { %1760 = vmatpush3.bf16.msra.mxu0 %v1905_v2 }
  0x6d   :  { %1782 = vmatpush3.bf16.msra.mxu1 %v1906_v3  ;;  %1761 = vmatprep.subr.bf16.mxu0 %v1907_v4 }
  0x6e   :  { %1783 = vmatprep.subr.bf16.mxu1 %v1908_v5 }
  0x70   :  { %1762 = vmatpush3.bf16.msra.mxu0 %v1909_v6 }
  0x71   :  { %1784 = vmatpush3.bf16.msra.mxu1 %v1910_v7  ;;  %1763 = vmatprep.subr.bf16.mxu0 %v1911_v8 }
  0x72   :  { %1785 = vmatprep.subr.bf16.mxu1 %v1912_v9 }
  0x74   :  { %1764 = vmatpush3.bf16.msra.mxu0 %v1913_v10 }
  0x75   :  { %1786 = vmatpush3.bf16.msra.mxu1 %v1914_v11  ;;  %1765 = vmatprep.subr.bf16.mxu0 %v1915_v12 }
  0x76   :  { %1787 = vmatprep.subr.bf16.mxu1 %v1916_v13 }
  0x78   :  { %1766 = vmatpush3.bf16.msra.mxu0 %v1917_v14 }
  0x79   :  { %1788 = vmatpush3.bf16.msra.mxu1 %v1918_v15  ;;  %1767 = vmatprep.subr.bf16.mxu0 %v1919_v16 }
  0x7a   :  { %1789 = vmatprep.subr.bf16.mxu1 %v1920_v17 }
  0x7c   :  { %1768 = vmatpush3.bf16.msra.mxu0 %v1921_v18 }
  0x7d   :  { %1790 = vmatpush3.bf16.msra.mxu1 %v1922_v19  ;;  %1769 = vmatprep.subr.bf16.mxu0 %v1923_v20 }
  0x7e   :  { %1791 = vmatprep.subr.bf16.mxu1 %v1924_v21 }
  0x80   :  { %1770 = vmatpush3.bf16.msra.mxu0 %v1925_v22 }
  0x81   :  { %1792 = vmatpush3.bf16.msra.mxu1 %v1926_v23 }
  0x83   :  { %1421 = vmatmul.mubr.bf16.vlgmr.msra.gmra.mrb[12].mxu0 %v1491_v27 }
  0x84   :  { %1462 = vmatmul.mubr.bf16.vlgmr.msra.gmra.mrb[12].mxu1 %v1493_v30 }
  0xf6   :  { %v1639_v32 = vpop.f32.mrb[0].mxu0 }
  0xf7   :  { %v1661_v33 = vpop.f32.mrb[0].mxu1  ;;  %v1640_v35 = vpop.f32.mrb[1].mxu0 }
  0xf8   :  { %v1641_v36 = vadd.f32 %v1640_v35, %v1639_v32  ;;  %v1662_v37 = vpop.f32.mrb[1].mxu1  ;;  %v1642_v38 = vpop.f32.mrb[2].mxu0 }
  0xf9   :  { %v1663_v39 = vadd.f32 %v1662_v37, %v1661_v33  ;;  %v1664_v40 = vpop.f32.mrb[2].mxu1  ;;  %v1643_v41 = vpop.f32.mrb[3].mxu0 }
  0xfa   :  { %v1177_v42 = vadd.f32 %v1641_v36, %v1478_v34  ;;  %v1644_v43 = vadd.f32 %v1643_v41, %v1642_v38  ;;  %v1665_v44 = vpop.f32.mrb[3].mxu1 }
  0xfb   :  { %v1666_v45 = vadd.f32 %v1665_v44, %v1664_v40 }
  0xfc   :  { %v1218_v46 = vadd.f32 %v1663_v39, %v1177_v42  ;;  %v1180_v47 = vadd.f32 %v1644_v43, %v1478_v34 }
  0xfe   :  { %v1221_v48 = vadd.f32 %v1666_v45, %v1180_v47 }
 0x116   :  { %v1683_v49 = vpop.f32.mrb[4].mxu0 }
 0x117   :  { %v1705_v50 = vpop.f32.mrb[4].mxu1  ;;  %v1684_v51 = vpop.f32.mrb[5].mxu0 }
 0x118   :  { %v1685_v52 = vadd.f32 %v1684_v51, %v1683_v49  ;;  %v1706_v53 = vpop.f32.mrb[5].mxu1  ;;  %v1686_v54 = vpop.f32.mrb[6].mxu0 }
 0x119   :  { %v1707_v55 = vadd.f32 %v1706_v53, %v1705_v50  ;;  %v1708_v56 = vpop.f32.mrb[6].mxu1  ;;  %v1687_v57 = vpop.f32.mrb[7].mxu0 }
 0x11a   :  { %v1259_v58 = vadd.f32 %v1685_v52, %v1218_v46  ;;  %v1688_v59 = vadd.f32 %v1687_v57, %v1686_v54  ;;  %v1709_v60 = vpop.f32.mrb[7].mxu1 }
 0x11b   :  { %v1710_v61 = vadd.f32 %v1709_v60, %v1708_v56 }
 0x11c   :  { %v1300_v62 = vadd.f32 %v1707_v55, %v1259_v58  ;;  %v1262_v63 = vadd.f32 %v1688_v59, %v1221_v48 }
 0x11e   :  { %v1303_v0 = vadd.f32 %v1710_v61, %v1262_v63 }
 0x136   :  { %v1727_v1 = vpop.f32.mrb[8].mxu0 }
 0x137   :  { %v1749_v2 = vpop.f32.mrb[8].mxu1  ;;  %v1728_v3 = vpop.f32.mrb[9].mxu0 }
 0x138   :  { %v1750_v4 = vpop.f32.mrb[9].mxu1  ;;  %v1729_v5 = vadd.f32 %v1728_v3, %v1727_v1  ;;  %v1730_v7 = vpop.f32.mrb[10].mxu0 }
 0x139   :  { %v1751_v6 = vadd.f32 %v1750_v4, %v1749_v2  ;;  %v1752_v8 = vpop.f32.mrb[10].mxu1  ;;  %v1731_v9 = vpop.f32.mrb[11].mxu0 }
 0x13a   :  { %v1753_v10 = vpop.f32.mrb[11].mxu1  ;;  %v1341_v11 = vadd.f32 %v1729_v5, %v1300_v62  ;;  %v1732_v12 = vadd.f32 %v1731_v9, %v1730_v7 }
 0x13b   :  { %v1754_v13 = vadd.f32 %v1753_v10, %v1752_v8 }
 0x13c   :  { %v1382_v14 = vadd.f32 %v1751_v6, %v1341_v11  ;;  %v1344_v15 = vadd.f32 %v1732_v12, %v1303_v0 }
 0x13e   :  { %v1385_v16 = vadd.f32 %v1754_v13, %v1344_v15 }
 0x156   :  { %v1771_v17 = vpop.f32.mrb[12].mxu0 }
 0x157   :  { %v1793_v18 = vpop.f32.mrb[12].mxu1  ;;  %v1772_v19 = vpop.f32.mrb[13].mxu0 }
 0x158   :  { %v1773_v20 = vadd.f32 %v1772_v19, %v1771_v17  ;;  %v1794_v21 = vpop.f32.mrb[13].mxu1  ;;  %v1774_v22 = vpop.f32.mrb[14].mxu0 }
 0x159   :  { %v1795_v23 = vadd.f32 %v1794_v21, %v1793_v18  ;;  %v1796_v24 = vpop.f32.mrb[14].mxu1  ;;  %v1775_v25 = vpop.f32.mrb[15].mxu0 }
 0x15a   :  { %v1423_v26 = vadd.f32 %v1773_v20, %v1382_v14  ;;  %v1776_v27 = vadd.f32 %v1775_v25, %v1774_v22  ;;  %v1797_v28 = vpop.f32.mrb[15].mxu1 }
 0x15b   :  { %v1798_v29 = vadd.f32 %v1797_v28, %v1796_v24 }
 0x15c   :  { %v1464_v30 = vadd.f32 %v1795_v23, %v1423_v26  ;;  %v1426_v31 = vadd.f32 %v1776_v27, %v1385_v16 }
 0x15e   :  { %v1470_v32 = vmax.f32 %v1464_v30, 0.0  ;;  %v1467_v33 = vadd.f32 %v1798_v29, %v1426_v31 }
 0x160   :  { %1472 = vst [vmem:[%s2391_s3] sm:$0xff] %v1470_v32  ;;  %v1471_v34 = vmax.f32 %v1467_v33, 0.0 }
 0x162   :  { %1473 = vst [vmem:[%s2391_s3 + $0x8] sm:$0xff] %v1471_v34 }

</bundles_post_ra>
